<compile_context>
chip_gen: v7x
topology: tpu7x:2x2x1
jax: 0.10.0
libtpu: 0.0.40
codegen_flags: <defaults>
</compile_context>

<pallas_src>
import itertools
import numpy as np

import jax
import jax.numpy as jnp
from jax.experimental import pallas as pl
from jax.experimental.pallas import tpu as pltpu

NODE_DIM = 30
EDGE_DIM = NODE_DIM * NODE_DIM                                 # 900
OPTICAL_NODES = [20, 21, 22, 23, 24, 25, 26, 27, 28, 29]
OPTICAL_EDGES = [(i, j) for i, j in itertools.product(OPTICAL_NODES, OPTICAL_NODES)
                 if i <= j]                                    # 55
OPT_TEMP_NODES = OPTICAL_NODES + [14, 15]                      # 12
OPT_TEMP_EDGES = [(i, j) for i, j in itertools.product(OPT_TEMP_NODES, OPT_TEMP_NODES)
                  if i <= j]                                   # 78
N_ON, N_OE = len(OPTICAL_NODES), len(OPTICAL_EDGES)            # 10, 55
N_LN, N_LE = len(OPT_TEMP_NODES), len(OPT_TEMP_EDGES)          # 12, 78


def _rup(n, m=128):
    return ((n + m - 1) // m) * m


# ---------------------------------------------------------------------------
# slab layout: every offset a kernel slice touches is a multiple of 128
# ---------------------------------------------------------------------------
def make_layout(input_dim, hidden, latent, num_features):
    D, H, L, F = input_dim, hidden, latent, num_features
    half = D // 2
    DEC = EDGE_DIM + NODE_DIM * F                              # edge | node flat
    lay = dict(D=D, H=H, L=L, F=F, half=half, DEC=DEC)

    # stage-1 output columns: [h1 (relu+BN) | a_opt,a_log (tanh)]
    H1W = _rup(H)
    ATTW = _rup(4 * half)
    lay.update(H1W=H1W, ATTW=ATTW, S1W=H1W + ATTW)

    # stage-2 output columns: [mu|logvar | on-logits | oe | ln | le], each in
    # its own 128-aligned slot so the softmax slices are aligned views.
    MUW = _rup(2 * L)
    off = 0
    lay["c_mulv"] = off; off += MUW
    lay["c_on"] = off;   off += _rup(N_ON)
    lay["c_oe"] = off;   off += _rup(N_OE)
    lay["c_ln"] = off;   off += _rup(N_LN)
    lay["c_le"] = off;   off += _rup(N_LE)
    lay.update(MUW=MUW, S2W=off)

    # decoder hidden width, stage-3 LHS / output columns
    H2W = _rup(H)
    PW = _rup(N_OE + N_ON)
    DECW = _rup(DEC)
    lay.update(H2W=H2W, PW=PW, L3W=H2W + PW, DECW=DECW, S3W=2 * DECW)

    # packed lane-dense output slab: [dec*f (DECW) | mu|logvar|0 (MUW)]
    lay["OUT"] = DECW + MUW

    # vec slab: biases / folded-BN / (1 - mask); all segment starts 128-aligned
    off = 0
    for name, w in [("b1", lay["S1W"]), ("scale1", H1W), ("shift1", H1W),
                    ("b2", lay["S2W"]), ("b_d1", H2W), ("scale2", H2W),
                    ("shift2", H2W), ("b3", lay["S3W"])]:
        lay["v_" + name] = (off, w)
        off += w
    lay["VECW"] = off
    return lay


# ---------------------------------------------------------------------------
# the fused kernel
# ---------------------------------------------------------------------------
def make_bae_kernel(lay, stage3_dtype=jnp.bfloat16):
    H1W, S1W = lay["H1W"], lay["S1W"]
    L, MUW = lay["L"], lay["MUW"]
    c_on, c_oe, c_ln, c_le = lay["c_on"], lay["c_oe"], lay["c_ln"], lay["c_le"]
    PW, DECW, S3W = lay["PW"], lay["DECW"], lay["S3W"]

    def kernel(xin_ref, w1_ref, w2_ref, wd1_ref, w3_ref, vec_ref, out_ref):
        def vsl(key):                           # aligned slice straight off the ref
            o, w = lay["v_" + key]
            return vec_ref[:, o:o + w]

        def mm(a, b):
            return jnp.dot(a, b, preferred_element_type=jnp.float32)

        xin = xin_ref[...]                      # (B, 3D) = [x | optical | log]
        B = xin.shape[0]

        # ---- stage 1: encoder first layer + both attention first layers -----
        s1 = mm(xin, w1_ref[...]) + vsl("b1")                       # (B, S1W)
        h1 = jnp.maximum(s1[:, 0:H1W], 0.0) * vsl("scale1") + vsl("shift1")
        att = jnp.tanh(s1[:, H1W:S1W])
        act1 = jnp.concatenate([h1, att], axis=-1)                  # (B, S1W)

        # ---- stage 2: [mu|logvar] + all four attention logit groups ---------
        s2 = mm(act1, w2_ref[...]) + vsl("b2")                      # (B, S2W)

        # ---- decoder hidden: z = mu (eval reparameterize) -------------------
        z = s2[:, 0:L]
        h2 = jnp.maximum(mm(z, wd1_ref[...]) + vsl("b_d1"), 0.0)
        h2 = h2 * vsl("scale2") + vsl("shift2")                     # (B, H2W)

        # ---- folded softmax pairs (divides on the EUP) -----------------------
        def softexp(v):
            m = jnp.max(v, axis=-1, keepdims=True)
            e = jnp.exp(v - m)
            return e, jnp.sum(e, axis=-1, keepdims=True)

        e_on, s_on = softexp(s2[:, c_on:c_on + N_ON])
        e_oe, s_oe = softexp(s2[:, c_oe:c_oe + N_OE])
        e_ln, s_ln = softexp(s2[:, c_ln:c_ln + N_LN])
        e_le, s_le = softexp(s2[:, c_le:c_le + N_LE])
        p_edge = (e_oe * e_le[:, 0:N_OE]) * pl.reciprocal(s_oe * s_le, approx=True)
        p_node = (e_on * e_ln[:, 0:N_ON]) * pl.reciprocal(s_on * s_ln, approx=True)

        # ---- stage 3: fused [decoder output | attention scatter] in bf16 ----
        pieces = [p_edge, p_node]
        pad = PW - (N_OE + N_ON)
        if pad:
            pieces.append(jnp.zeros((B, pad), jnp.float32))
        p_comb = jnp.concatenate(pieces, axis=-1)                   # (B, PW)
        lhs3 = jnp.concatenate([h2, p_comb], axis=-1).astype(stage3_dtype)
        s3 = mm(lhs3, w3_ref[...]) + vsl("b3")                      # (B, 2*DECW)

        # dec * (scatter + (1 - mask));  (1-mask) is folded into b3.
        prod = s3[:, 0:DECW] * s3[:, DECW:S3W]                      # (B, DECW)

        # ---- ONE lane-dense full-width store: [dec*f | mu|logvar|0] ----------
        out_ref[...] = jnp.concatenate([prod, s2[:, 0:MUW]], axis=-1)

    return kernel


# ---------------------------------------------------------------------------
# host wrapper
# ---------------------------------------------------------------------------
def _auto_tile_b(B):
    # v5e/v6e (single TC, 128 MiB VMEM): stay untiled up to a few thousand rows
    # (grid steps only add ~0.35us each).  v7x (2 TCs, 64 MiB VMEM): per-row
    # live intermediates are ~16 KB, so switch to 512-row "parallel" tiles
    # around B ~ 2k to shard both cores and stay inside scoped VMEM.
    if B >= 2048 and B % 512 == 0:
        return 512
    return None


def bae_forward(x, optical, log_x, slabs, lay, tile_b=None):
    B, D = x.shape
    L, F = lay["L"], lay["F"]
    DEC, DECW, OUT = lay["DEC"], lay["DECW"], lay["OUT"]
    kernel = make_bae_kernel(lay, stage3_dtype=slabs["w3"].dtype)
    w1, w2, wd1, w3, vec = (slabs["w1"], slabs["w2"], slabs["wd1"],
                            slabs["w3"], slabs["vec"])

    # one concatenated input DMA instead of three
    xin = jnp.concatenate([x, optical, log_x], axis=-1)            # (B, 3D)
    args = (xin, w1, w2, wd1, w3, vec)

    flops = 2 * B * (3 * D * lay["S1W"] + lay["S1W"] * lay["S2W"]
                     + L * lay["H2W"] + lay["L3W"] * lay["S3W"])
    transcendentals = B * (lay["ATTW"] + N_ON + N_OE + N_LN + N_LE + 4)
    bytes_accessed = int(sum(int(a.size) * a.dtype.itemsize for a in args)
                         + B * OUT * 4)
    cost = pl.CostEstimate(flops=int(flops), transcendentals=int(transcendentals),
                           bytes_accessed=bytes_accessed)

    out_shape = jax.ShapeDtypeStruct((B, OUT), jnp.float32)

    if tile_b is None:
        tile_b = _auto_tile_b(B)

    if tile_b is None or tile_b >= B:
        # Single block: ~2 MiB of params, 7 input DMAs + 1 output DMA.
        vmem = pl.BlockSpec(memory_space=pltpu.MemorySpace.VMEM)
        out = pl.pallas_call(
            kernel,
            out_shape=out_shape,
            in_specs=[vmem] * len(args),
            out_specs=vmem,
            cost_estimate=cost,
        )(*args)
    else:
        # Batch-tiled "parallel" grid (large batches / v7x dual-TensorCore).
        tb = tile_b
        assert B % tb == 0 and tb % 8 == 0, (
            "tiled path requires B %% tile_b == 0 and tile_b %% 8 == 0 "
            "(partial edge blocks would be recomputed/re-stored)")
        row = lambda c: pl.BlockSpec((tb, c), lambda i: (i, 0))
        full = lambda a: pl.BlockSpec(a.shape, lambda i: (0, 0))
        out = pl.pallas_call(
            kernel,
            out_shape=out_shape,
            grid=(B // tb,),
            in_specs=[row(3 * D), full(w1), full(w2), full(wd1), full(w3), full(vec)],
            out_specs=row(OUT),
            compiler_params=pltpu.CompilerParams(
                dimension_semantics=("parallel",),
                vmem_limit_bytes=48 * 1024 * 1024),
            cost_estimate=cost,
        )(*args)

    edge = out[:, :EDGE_DIM].reshape(B, NODE_DIM, NODE_DIM)
    node = out[:, EDGE_DIM:DEC].reshape(B, NODE_DIM, F)
    mu = out[:, DECW:DECW + L]
    logvar = out[:, DECW + L:DECW + 2 * L]
    return edge, node, mu, logvar


# ---------------------------------------------------------------------------
# deterministic parameter construction (synthetic, matching __init__ shapes)
# ---------------------------------------------------------------------------
def make_params(key, input_dim, hidden, latent, num_features):
    half = input_dim // 2
    keys = iter(jax.random.split(key, 64))

    def rnd(shape, scale=0.1):
        return scale * jax.random.normal(next(keys), shape, dtype=jnp.float32)

    def folded_bn(dim):
        gamma = 1.0 + rnd((1, dim))
        beta = rnd((1, dim))
        mean = rnd((1, dim))
        var = 1.0 + jnp.abs(rnd((1, dim)))
        scale = gamma / jnp.sqrt(var + 1e-5)
        shift = beta - mean * scale
        return scale, shift

    p = {}
    p["w_enc"], p["b_enc"] = rnd((input_dim, hidden)), rnd((1, hidden))
    p["scale1"], p["shift1"] = folded_bn(hidden)
    p["w_mu"], p["b_mu"] = rnd((hidden, latent)), rnd((1, latent))
    p["w_lv"], p["b_lv"] = rnd((hidden, latent)), rnd((1, latent))
    p["w_d1"], p["b_d1"] = rnd((latent, hidden)), rnd((1, hidden))
    p["scale2"], p["shift2"] = folded_bn(hidden)
    node_flat = NODE_DIM * num_features
    p["w_de"], p["b_de"] = rnd((hidden, EDGE_DIM)), rnd((1, EDGE_DIM))
    p["w_dn"], p["b_dn"] = rnd((hidden, node_flat)), rnd((1, node_flat))
    p["won1"], p["bon1"] = rnd((input_dim, half)), rnd((1, half))
    p["won2"], p["bon2"] = rnd((half, N_ON)), rnd((1, N_ON))
    p["woe1"], p["boe1"] = rnd((input_dim, half)), rnd((1, half))
    p["woe2"], p["boe2"] = rnd((half, N_OE)), rnd((1, N_OE))
    p["wln1"], p["bln1"] = rnd((input_dim, half)), rnd((1, half))
    p["wln2"], p["bln2"] = rnd((half, N_LN)), rnd((1, N_LN))
    p["wle1"], p["ble1"] = rnd((input_dim, half)), rnd((1, half))
    p["wle2"], p["ble2"] = rnd((half, N_LE)), rnd((1, N_LE))
    return p


def pack_params(p, lay, stage3_dtype=jnp.bfloat16):
    D, H, L, F = lay["D"], lay["H"], lay["L"], lay["F"]
    half, DEC = lay["half"], lay["DEC"]
    H1W, S1W, S2W = lay["H1W"], lay["S1W"], lay["S2W"]
    H2W, L3W, DECW, S3W = lay["H2W"], lay["L3W"], lay["DECW"], lay["S3W"]

    def npf(a):
        return np.asarray(a, np.float32)

    # --- stage-1 weight (3D, S1W): block-diag [x->h1 | optical->a_opt | log->a_log]
    w1 = np.zeros((3 * D, S1W), np.float32)
    w1[0:D, 0:H] = npf(p["w_enc"])
    w1[D:2 * D, H1W:H1W + half] = npf(p["won1"])
    w1[D:2 * D, H1W + half:H1W + 2 * half] = npf(p["woe1"])
    w1[2 * D:3 * D, H1W + 2 * half:H1W + 3 * half] = npf(p["wln1"])
    w1[2 * D:3 * D, H1W + 3 * half:H1W + 4 * half] = npf(p["wle1"])

    # --- stage-2 weight (S1W, S2W): block-diag [h1->mu|logvar | attn 2nd layers]
    w2 = np.zeros((S1W, S2W), np.float32)
    w2[0:H, 0:L] = npf(p["w_mu"])
    w2[0:H, L:2 * L] = npf(p["w_lv"])
    r = H1W
    w2[r:r + half, lay["c_on"]:lay["c_on"] + N_ON] = npf(p["won2"])
    w2[r + half:r + 2 * half, lay["c_oe"]:lay["c_oe"] + N_OE] = npf(p["woe2"])
    w2[r + 2 * half:r + 3 * half, lay["c_ln"]:lay["c_ln"] + N_LN] = npf(p["wln2"])
    w2[r + 3 * half:r + 4 * half, lay["c_le"]:lay["c_le"] + N_LE] = npf(p["wle2"])

    # --- decoder first layer (L, H2W)
    wd1 = np.zeros((L, H2W), np.float32)
    wd1[:, 0:H] = npf(p["w_d1"])

    # --- stage-3 weight (L3W, S3W): block-diag [h2 -> decoder out | p_comb -> one-hot scatter]
    w3 = np.zeros((L3W, S3W), np.float32)
    w3[0:H, 0:EDGE_DIM] = npf(p["w_de"])
    w3[0:H, EDGE_DIM:DEC] = npf(p["w_dn"])
    one_minus_mask = np.ones((DEC,), np.float32)
    for idx, (i, j) in enumerate(OPTICAL_EDGES):
        c = i * NODE_DIM + j
        w3[H2W + idx, DECW + c] = 1.0
        one_minus_mask[c] = 0.0
    for idx, n in enumerate(OPTICAL_NODES):
        c0 = EDGE_DIM + n * F
        w3[H2W + N_OE + idx, DECW + c0:DECW + c0 + F] = 1.0
        one_minus_mask[c0:c0 + F] = 0.0

    # --- vec slab: all biases / folded BN / (1 - mask), 128-aligned segments
    vec = np.zeros((1, lay["VECW"]), np.float32)

    def put(key, col, val):
        o, _ = lay["v_" + key]
        val = npf(val).reshape(-1)
        vec[0, o + col:o + col + val.size] = val

    put("b1", 0, p["b_enc"])
    put("b1", H1W, np.concatenate([npf(p["bon1"]).reshape(-1), npf(p["boe1"]).reshape(-1),
                                   npf(p["bln1"]).reshape(-1), npf(p["ble1"]).reshape(-1)]))
    put("scale1", 0, p["scale1"]); put("shift1", 0, p["shift1"])
    put("b2", 0, np.concatenate([npf(p["b_mu"]).reshape(-1), npf(p["b_lv"]).reshape(-1)]))
    put("b2", lay["c_on"], p["bon2"]); put("b2", lay["c_oe"], p["boe2"])
    put("b2", lay["c_ln"], p["bln2"]); put("b2", lay["c_le"], p["ble2"])
    put("b_d1", 0, p["b_d1"]); put("scale2", 0, p["scale2"]); put("shift2", 0, p["shift2"])
    put("b3", 0, np.concatenate([npf(p["b_de"]).reshape(-1), npf(p["b_dn"]).reshape(-1)]))
    put("b3", DECW, one_minus_mask)

    return dict(w1=jnp.asarray(w1), w2=jnp.asarray(w2), wd1=jnp.asarray(wd1),
                w3=jnp.asarray(w3, dtype=stage3_dtype), vec=jnp.asarray(vec))


# ---------------------------------------------------------------------------
# pure-JAX reference mirroring the PyTorch forward (eval mode) for verification
# ---------------------------------------------------------------------------
def reference_forward(x, optical, log_x, p, num_features):
    hi = jax.lax.Precision.HIGHEST

    def lin(a, w, b):
        return jnp.dot(a, w, precision=hi) + b

    B = x.shape[0]
    h1 = jnp.maximum(lin(x, p["w_enc"], p["b_enc"]), 0.0) * p["scale1"] + p["shift1"]
    mu = lin(h1, p["w_mu"], p["b_mu"])
    logvar = lin(h1, p["w_lv"], p["b_lv"])
    z = mu
    h2 = jnp.maximum(lin(z, p["w_d1"], p["b_d1"]), 0.0) * p["scale2"] + p["shift2"]
    edge_repr = lin(h2, p["w_de"], p["b_de"]).reshape(B, NODE_DIM, NODE_DIM)
    node_repr = lin(h2, p["w_dn"], p["b_dn"]).reshape(B, NODE_DIM, num_features)

    def attn_raw(inp, w1, b1, w2, b2):
        return lin(jnp.tanh(lin(inp, w1, b1)), w2, b2)

    on_w = attn_raw(optical, p["won1"], p["bon1"], p["won2"], p["bon2"])
    oe_w = attn_raw(optical, p["woe1"], p["boe1"], p["woe2"], p["boe2"])
    ln_w = attn_raw(log_x, p["wln1"], p["bln1"], p["wln2"], p["bln2"])
    le_w = attn_raw(log_x, p["wle1"], p["ble1"], p["wle2"], p["ble2"])

    def apply_attention(node_r, edge_r, nw, ew):
        naw = jax.nn.softmax(nw, axis=1)
        eaw = jax.nn.softmax(ew, axis=1)
        enr = node_r
        for idx, node in enumerate(OPTICAL_NODES):
            enr = enr.at[:, node, :].set(node_r[:, node, :] * naw[:, idx:idx + 1])
        eer = edge_r
        for idx, (i, j) in enumerate(OPTICAL_EDGES):
            eer = eer.at[:, i, j].set(edge_r[:, i, j] * eaw[:, idx])
        return enr, eer

    node_repr, edge_repr = apply_attention(node_repr, edge_repr, on_w, oe_w)
    node_repr, edge_repr = apply_attention(node_repr, edge_repr, ln_w, le_w)
    return edge_repr, node_repr, mu, logvar


if __name__ == "__main__":
    B, INPUT_DIM, HIDDEN, LATENT, NUM_FEATURES = 8, 64, 32, 16, 4

    key = jax.random.PRNGKey(0)
    k_param, k_x, k_opt, k_log = jax.random.split(key, 4)
    params = make_params(k_param, INPUT_DIM, HIDDEN, LATENT, NUM_FEATURES)
    lay = make_layout(INPUT_DIM, HIDDEN, LATENT, NUM_FEATURES)
    slabs = pack_params(params, lay)

    x = jax.random.normal(k_x, (B, INPUT_DIM), dtype=jnp.float32)
    optical = jax.random.normal(k_opt, (B, INPUT_DIM), dtype=jnp.float32)
    log_x = jax.random.normal(k_log, (B, INPUT_DIM), dtype=jnp.float32)

    edge_repr, node_repr, mu, logvar = jax.block_until_ready(
        bae_forward(x, optical, log_x, slabs, lay))

    r_edge, r_node, r_mu, r_lv = reference_forward(x, optical, log_x, params, NUM_FEATURES)
    # mu/logvar stay on the pure-f32 matmul path -> tight tolerance;
    # edge/node pass through the bf16 stage-3 slab + approx reciprocal.
    np.testing.assert_allclose(np.asarray(mu), np.asarray(r_mu), rtol=1e-2, atol=1e-3)
    np.testing.assert_allclose(np.asarray(logvar), np.asarray(r_lv), rtol=1e-2, atol=1e-3)
    np.testing.assert_allclose(np.asarray(edge_repr), np.asarray(r_edge), rtol=2e-2, atol=5e-3)
    np.testing.assert_allclose(np.asarray(node_repr), np.asarray(r_node), rtol=2e-2, atol=5e-3)

    assert edge_repr.shape == (B, NODE_DIM, NODE_DIM)
    assert node_repr.shape == (B, NODE_DIM, NUM_FEATURES)
    assert mu.shape == (B, LATENT) and logvar.shape == (B, LATENT)

    # Exercise the batch-tiled ("parallel" grid) path.  Production tiles should
    # be >= 256-512 rows (v7x dual-TC); tiny tiles here only test correctness.
    B2, tile_b = 64, 16
    k2x, k2o, k2l = jax.random.split(jax.random.PRNGKey(1), 3)
    x2 = jax.random.normal(k2x, (B2, INPUT_DIM), dtype=jnp.float32)
    opt2 = jax.random.normal(k2o, (B2, INPUT_DIM), dtype=jnp.float32)
    log2 = jax.random.normal(k2l, (B2, INPUT_DIM), dtype=jnp.float32)
    e2, n2, m2, l2 = jax.block_until_ready(
        bae_forward(x2, opt2, log2, slabs, lay, tile_b=tile_b))
    re2, rn2, rm2, rl2 = reference_forward(x2, opt2, log2, params, NUM_FEATURES)
    np.testing.assert_allclose(np.asarray(m2), np.asarray(rm2), rtol=1e-2, atol=1e-3)
    np.testing.assert_allclose(np.asarray(l2), np.asarray(rl2), rtol=1e-2, atol=1e-3)
    np.testing.assert_allclose(np.asarray(e2), np.asarray(re2), rtol=2e-2, atol=5e-3)
    np.testing.assert_allclose(np.asarray(n2), np.asarray(rn2), rtol=2e-2, atol=5e-3)

    print("KERNEL_OK")
</pallas_src>

<mosaic_0001>
module attributes {stable_mosaic.version = 11 : i64} {
  func.func @kernel(%arg0: memref<8x192xf32, #tpu.memory_space<vmem>>, %arg1: memref<192x256xf32, #tpu.memory_space<vmem>>, %arg2: memref<256x640xf32, #tpu.memory_space<vmem>>, %arg3: memref<16x128xf32, #tpu.memory_space<vmem>>, %arg4: memref<256x2048xbf16, #tpu.memory_space<vmem>>, %arg5: memref<1x3584xf32, #tpu.memory_space<vmem>>, %arg6: memref<8x1152xf32, #tpu.memory_space<vmem>>) attributes {dimension_semantics = [], scalar_prefetch = 0 : i64, scratch_operands = 0 : i64, tpu.core_type = #tpu.core_type<tc>} {
    %c0 = arith.constant 0 : index
    %c0_0 = arith.constant 0 : index
    %0 = vector.load %arg0[%c0, %c0_0] : memref<8x192xf32, #tpu.memory_space<vmem>>, vector<8x192xf32>
    %c0_1 = arith.constant 0 : index
    %c0_2 = arith.constant 0 : index
    %1 = vector.load %arg1[%c0_1, %c0_2] : memref<192x256xf32, #tpu.memory_space<vmem>>, vector<192x256xf32>
    %cst = arith.constant dense<0.000000e+00> : vector<8x256xf32>
    %2 = tpu.matmul %0, %1, %cst {dimension_numbers = #tpu.dot_dimension_numbers<[1], [0], [0], [1], [0, 0, 1, 1], [], []>} : vector<8x192xf32>, vector<192x256xf32>, vector<8x256xf32> -> vector<8x256xf32>
    %c0_3 = arith.constant 0 : index
    %c0_4 = arith.constant 0 : index
    %3 = vector.load %arg5[%c0_3, %c0_4] : memref<1x3584xf32, #tpu.memory_space<vmem>>, vector<1x256xf32>
    %4 = vector.broadcast %3 : vector<1x256xf32> to vector<8x256xf32>
    %5 = arith.addf %2, %4 : vector<8x256xf32>
    %6 = vector.extract_strided_slice %5 {offsets = [0, 0], sizes = [8, 128], strides = [1, 1]} : vector<8x256xf32> to vector<8x128xf32>
    %cst_5 = arith.constant 0.000000e+00 : f32
    %7 = vector.broadcast %cst_5 : f32 to vector<8x128xf32>
    %8 = arith.maximumf %6, %7 : vector<8x128xf32>
    %c0_6 = arith.constant 0 : index
    %c256 = arith.constant 256 : index
    %9 = vector.load %arg5[%c0_6, %c256] : memref<1x3584xf32, #tpu.memory_space<vmem>>, vector<1x128xf32>
    %10 = vector.broadcast %9 : vector<1x128xf32> to vector<8x128xf32>
    %11 = arith.mulf %8, %10 : vector<8x128xf32>
    %c0_7 = arith.constant 0 : index
    %c384 = arith.constant 384 : index
    %12 = vector.load %arg5[%c0_7, %c384] : memref<1x3584xf32, #tpu.memory_space<vmem>>, vector<1x128xf32>
    %13 = vector.broadcast %12 : vector<1x128xf32> to vector<8x128xf32>
    %14 = arith.addf %11, %13 : vector<8x128xf32>
    %15 = vector.extract_strided_slice %5 {offsets = [0, 128], sizes = [8, 128], strides = [1, 1]} : vector<8x256xf32> to vector<8x128xf32>
    %16 = math.tanh %15 : vector<8x128xf32>
    %17 = tpu.concatenate %14, %16 in 1 : vector<8x128xf32>, vector<8x128xf32> -> vector<8x256xf32>
    %c0_8 = arith.constant 0 : index
    %c0_9 = arith.constant 0 : index
    %18 = vector.load %arg2[%c0_8, %c0_9] : memref<256x640xf32, #tpu.memory_space<vmem>>, vector<256x640xf32>
    %cst_10 = arith.constant dense<0.000000e+00> : vector<8x640xf32>
    %19 = tpu.matmul %17, %18, %cst_10 {dimension_numbers = #tpu.dot_dimension_numbers<[1], [0], [0], [1], [0, 0, 1, 1], [], []>} : vector<8x256xf32>, vector<256x640xf32>, vector<8x640xf32> -> vector<8x640xf32>
    %c0_11 = arith.constant 0 : index
    %c512 = arith.constant 512 : index
    %20 = vector.load %arg5[%c0_11, %c512] : memref<1x3584xf32, #tpu.memory_space<vmem>>, vector<1x640xf32>
    %21 = vector.broadcast %20 : vector<1x640xf32> to vector<8x640xf32>
    %22 = arith.addf %19, %21 : vector<8x640xf32>
    %23 = vector.extract_strided_slice %22 {offsets = [0, 0], sizes = [8, 16], strides = [1, 1]} : vector<8x640xf32> to vector<8x16xf32>
    %c0_12 = arith.constant 0 : index
    %c0_13 = arith.constant 0 : index
    %24 = vector.load %arg3[%c0_12, %c0_13] : memref<16x128xf32, #tpu.memory_space<vmem>>, vector<16x128xf32>
    %cst_14 = arith.constant dense<0.000000e+00> : vector<8x128xf32>
    %25 = tpu.matmul %23, %24, %cst_14 {dimension_numbers = #tpu.dot_dimension_numbers<[1], [0], [0], [1], [0, 0, 1, 1], [], []>} : vector<8x16xf32>, vector<16x128xf32>, vector<8x128xf32> -> vector<8x128xf32>
    %c0_15 = arith.constant 0 : index
    %c1152 = arith.constant 1152 : index
    %26 = vector.load %arg5[%c0_15, %c1152] : memref<1x3584xf32, #tpu.memory_space<vmem>>, vector<1x128xf32>
    %27 = vector.broadcast %26 : vector<1x128xf32> to vector<8x128xf32>
    %28 = arith.addf %25, %27 : vector<8x128xf32>
    %cst_16 = arith.constant 0.000000e+00 : f32
    %29 = vector.broadcast %cst_16 : f32 to vector<8x128xf32>
    %30 = arith.maximumf %28, %29 : vector<8x128xf32>
    %c0_17 = arith.constant 0 : index
    %c1280 = arith.constant 1280 : index
    %31 = vector.load %arg5[%c0_17, %c1280] : memref<1x3584xf32, #tpu.memory_space<vmem>>, vector<1x128xf32>
    %32 = vector.broadcast %31 : vector<1x128xf32> to vector<8x128xf32>
    %33 = arith.mulf %30, %32 : vector<8x128xf32>
    %c0_18 = arith.constant 0 : index
    %c1408 = arith.constant 1408 : index
    %34 = vector.load %arg5[%c0_18, %c1408] : memref<1x3584xf32, #tpu.memory_space<vmem>>, vector<1x128xf32>
    %35 = vector.broadcast %34 : vector<1x128xf32> to vector<8x128xf32>
    %36 = arith.addf %33, %35 : vector<8x128xf32>
    %37 = vector.extract_strided_slice %22 {offsets = [0, 128], sizes = [8, 10], strides = [1, 1]} : vector<8x640xf32> to vector<8x10xf32>
    %cst_19 = arith.constant dense<0xFF800000> : vector<8xf32>
    %38 = vector.multi_reduction <maximumf>, %37, %cst_19 [1] : vector<8x10xf32> to vector<8xf32>
    %39 = vector.shape_cast %38 : vector<8xf32> to vector<8x1xf32>
    %40 = vector.broadcast %39 : vector<8x1xf32> to vector<8x10xf32>
    %41 = arith.subf %37, %40 : vector<8x10xf32>
    %42 = math.exp %41 : vector<8x10xf32>
    %cst_20 = arith.constant dense<0.000000e+00> : vector<8xf32>
    %43 = vector.multi_reduction <add>, %42, %cst_20 [1] : vector<8x10xf32> to vector<8xf32>
    %44 = vector.shape_cast %43 : vector<8xf32> to vector<8x1xf32>
    %45 = vector.extract_strided_slice %22 {offsets = [0, 256], sizes = [8, 55], strides = [1, 1]} : vector<8x640xf32> to vector<8x55xf32>
    %cst_21 = arith.constant dense<0xFF800000> : vector<8xf32>
    %46 = vector.multi_reduction <maximumf>, %45, %cst_21 [1] : vector<8x55xf32> to vector<8xf32>
    %47 = vector.shape_cast %46 : vector<8xf32> to vector<8x1xf32>
    %48 = vector.broadcast %47 : vector<8x1xf32> to vector<8x55xf32>
    %49 = arith.subf %45, %48 : vector<8x55xf32>
    %50 = math.exp %49 : vector<8x55xf32>
    %cst_22 = arith.constant dense<0.000000e+00> : vector<8xf32>
    %51 = vector.multi_reduction <add>, %50, %cst_22 [1] : vector<8x55xf32> to vector<8xf32>
    %52 = vector.shape_cast %51 : vector<8xf32> to vector<8x1xf32>
    %53 = vector.extract_strided_slice %22 {offsets = [0, 384], sizes = [8, 12], strides = [1, 1]} : vector<8x640xf32> to vector<8x12xf32>
    %cst_23 = arith.constant dense<0xFF800000> : vector<8xf32>
    %54 = vector.multi_reduction <maximumf>, %53, %cst_23 [1] : vector<8x12xf32> to vector<8xf32>
    %55 = vector.shape_cast %54 : vector<8xf32> to vector<8x1xf32>
    %56 = vector.broadcast %55 : vector<8x1xf32> to vector<8x12xf32>
    %57 = arith.subf %53, %56 : vector<8x12xf32>
    %58 = math.exp %57 : vector<8x12xf32>
    %cst_24 = arith.constant dense<0.000000e+00> : vector<8xf32>
    %59 = vector.multi_reduction <add>, %58, %cst_24 [1] : vector<8x12xf32> to vector<8xf32>
    %60 = vector.shape_cast %59 : vector<8xf32> to vector<8x1xf32>
    %61 = vector.extract_strided_slice %22 {offsets = [0, 512], sizes = [8, 78], strides = [1, 1]} : vector<8x640xf32> to vector<8x78xf32>
    %cst_25 = arith.constant dense<0xFF800000> : vector<8xf32>
    %62 = vector.multi_reduction <maximumf>, %61, %cst_25 [1] : vector<8x78xf32> to vector<8xf32>
    %63 = vector.shape_cast %62 : vector<8xf32> to vector<8x1xf32>
    %64 = vector.broadcast %63 : vector<8x1xf32> to vector<8x78xf32>
    %65 = arith.subf %61, %64 : vector<8x78xf32>
    %66 = math.exp %65 : vector<8x78xf32>
    %cst_26 = arith.constant dense<0.000000e+00> : vector<8xf32>
    %67 = vector.multi_reduction <add>, %66, %cst_26 [1] : vector<8x78xf32> to vector<8xf32>
    %68 = vector.shape_cast %67 : vector<8xf32> to vector<8x1xf32>
    %69 = vector.extract_strided_slice %66 {offsets = [0, 0], sizes = [8, 55], strides = [1, 1]} : vector<8x78xf32> to vector<8x55xf32>
    %70 = arith.mulf %50, %69 : vector<8x55xf32>
    %71 = arith.mulf %52, %68 : vector<8x1xf32>
    %72 = tpu.reciprocal %71 {approx = true} : vector<8x1xf32> -> vector<8x1xf32>
    %73 = vector.broadcast %72 : vector<8x1xf32> to vector<8x55xf32>
    %74 = arith.mulf %70, %73 : vector<8x55xf32>
    %75 = vector.extract_strided_slice %58 {offsets = [0, 0], sizes = [8, 10], strides = [1, 1]} : vector<8x12xf32> to vector<8x10xf32>
    %76 = arith.mulf %42, %75 : vector<8x10xf32>
    %77 = arith.mulf %44, %60 : vector<8x1xf32>
    %78 = tpu.reciprocal %77 {approx = true} : vector<8x1xf32> -> vector<8x1xf32>
    %79 = vector.broadcast %78 : vector<8x1xf32> to vector<8x10xf32>
    %80 = arith.mulf %76, %79 : vector<8x10xf32>
    %cst_27 = arith.constant 0.000000e+00 : f32
    %81 = vector.broadcast %cst_27 : f32 to vector<8x63xf32>
    %82 = tpu.concatenate %74, %80, %81 in 1 : vector<8x55xf32>, vector<8x10xf32>, vector<8x63xf32> -> vector<8x128xf32>
    %83 = tpu.concatenate %36, %82 in 1 : vector<8x128xf32>, vector<8x128xf32> -> vector<8x256xf32>
    %84 = arith.truncf %83 : vector<8x256xf32> to vector<8x256xbf16>
    %c0_28 = arith.constant 0 : index
    %c0_29 = arith.constant 0 : index
    %85 = vector.load %arg4[%c0_28, %c0_29] : memref<256x2048xbf16, #tpu.memory_space<vmem>>, vector<256x2048xbf16>
    %cst_30 = arith.constant dense<0.000000e+00> : vector<8x2048xf32>
    %86 = tpu.matmul %84, %85, %cst_30 {dimension_numbers = #tpu.dot_dimension_numbers<[1], [0], [0], [1], [0, 0, 1, 1], [], []>} : vector<8x256xbf16>, vector<256x2048xbf16>, vector<8x2048xf32> -> vector<8x2048xf32>
    %c0_31 = arith.constant 0 : index
    %c1536 = arith.constant 1536 : index
    %87 = vector.load %arg5[%c0_31, %c1536] : memref<1x3584xf32, #tpu.memory_space<vmem>>, vector<1x2048xf32>
    %88 = vector.broadcast %87 : vector<1x2048xf32> to vector<8x2048xf32>
    %89 = arith.addf %86, %88 : vector<8x2048xf32>
    %90 = vector.extract_strided_slice %89 {offsets = [0, 0], sizes = [8, 1024], strides = [1, 1]} : vector<8x2048xf32> to vector<8x1024xf32>
    %91 = vector.extract_strided_slice %89 {offsets = [0, 1024], sizes = [8, 1024], strides = [1, 1]} : vector<8x2048xf32> to vector<8x1024xf32>
    %92 = arith.mulf %90, %91 : vector<8x1024xf32>
    %93 = vector.extract_strided_slice %22 {offsets = [0, 0], sizes = [8, 128], strides = [1, 1]} : vector<8x640xf32> to vector<8x128xf32>
    %94 = tpu.concatenate %92, %93 in 1 : vector<8x1024xf32>, vector<8x128xf32> -> vector<8x1152xf32>
    %c0_32 = arith.constant 0 : index
    %c0_33 = arith.constant 0 : index
    %95 = vector.load %arg6[%c0_32, %c0_33] : memref<8x1152xf32, #tpu.memory_space<vmem>>, vector<8x1152xf32>
    tpu.vector_store %arg6[%c0_32, %c0_33], %94 {strides = array<i32>} : memref<8x1152xf32, #tpu.memory_space<vmem>>, vector<8x1152xf32>,
    return
  }
}

</mosaic_0001>

<bundles_post_ra>
// kernel: tpu_custom_call.1
= control target key start
LH: loop header
LB: loop body
LE: loop exit
PB: predicated region body
PF: predicated region fallthrough
CT: control target
= control target key end

     0   :  { %11 = vsyncpa [#allocation3], 0  ;;  %s3779_s0 = inlined_call_operand.hbm [shape: f32[8,192], index: 0, kind: input, shape index: {}]   ;;  %s3780_s1 = inlined_call_operand.hbm [shape: f32[192,256], index: 1, kind: input, shape index: {}]   ;;  %s3781_s2 = inlined_call_operand.hbm [shape: f32[256,640], index: 2, kind: input, shape index: {}]   ;;  %s3782_s3 = inlined_call_operand.hbm [shape: f32[16,128], index: 3, kind: input, shape index: {}]   ;;  %s3783_s4 = inlined_call_operand.hbm [shape: bf16[256,2048], index: 4, kind: input, shape index: {}]   ;;  %s3784_s5 = inlined_call_operand.hbm [shape: f32[1,3584], index: 5, kind: input, shape index: {}]   ;;  %s3785_s6 = inlined_call_operand.hbm [shape: f32[8,1152], index: 6, kind: output, shape index: {}]  }
   0x1   :  { %12 = vsyncpa [#allocation6], 0 }
   0x2   :  { %13 = vsyncpa [#allocation9], 0 }
   0x3   :  { %14 = vsyncpa [#allocation12], 0 }
   0x4   :  { %15 = vsyncpa [#allocation4], 0  ;;  %s3536_s21 = smov [#allocation5]   ;;  %s3372_s25 = scalar_lea.hbm %s3780_s1, 6144 }
   0x5   :  { %s31_s22 = sshll.u32 %s3536_s21, 4  ;;  %p3373_p0 = scmp.ne.s32.totalorder %s3780_s1, %s3372_s25  ;;  %s32_s22 = int_to_ptr.vmem [resolvable:$true] %s31_s22 }
   0x6   :  { %p3376_p1 = scmp.lt.u32.totalorder %s3372_s25, %s3780_s1 }
   0x8   :  { %p3378_p2 = pnand %p3376_p1, %p3373_p0 }
   0xa   :  { %3381 = shalt.err (!%p3378_p2)
}
   0xb   :  { %s3382_s30 = scalar_lea.vmem %s32_s22, 6144  ;;  %p3387_p4 = scmp.lt.s32.totalorder %s32_s22, %s32_s22 }
   0xc   :  { %p3383_p3 = scmp.ne.s32.totalorder %s32_s22, %s3382_s30  ;;  %p3388_p5 = scmp.lt.s32.totalorder %s3382_s30, %s3382_s30 }
   0xe   :  { %p3389_p6 = por %p3388_p5, %p3387_p4 }
  0x10   :  { %p3390_p7 = pnand %p3389_p6, %p3383_p3 }
  0x12   :  { %3393 = shalt.err (!%p3390_p7)
}
  0x13   :  { %s3537_s7 = smov 256   ;;  %s3538_s8 = smov 16  }
  0x14   :  { %37 = dma.hbm_to_vmem [thread:$0]  %s3780_s1, 6144, %s32_s22, [#allocation6], %s3537_s7, %s3537_s7, %s3538_s8  }
  0x15   :  { %s3539_s11 = smov [#allocation8]   ;;  %s3394_s15 = scalar_lea.hbm %s3782_s3, 256 }
  0x16   :  { %s55_s12 = sshll.u32 %s3539_s11, 4  ;;  %p3395_p8 = scmp.ne.s32.totalorder %s3782_s3, %s3394_s15  ;;  %s56_s12 = int_to_ptr.vmem [resolvable:$true] %s55_s12 }
  0x17   :  { %p3398_p9 = scmp.lt.u32.totalorder %s3394_s15, %s3782_s3 }
  0x19   :  { %p3400_p10 = pnand %p3398_p9, %p3395_p8 }
  0x1b   :  { %3403 = shalt.err (!%p3400_p10)
}
  0x1c   :  { %s3404_s20 = scalar_lea.vmem %s56_s12, 256  ;;  %p3409_p12 = scmp.lt.s32.totalorder %s56_s12, %s56_s12 }
  0x1d   :  { %p3405_p11 = scmp.ne.s32.totalorder %s56_s12, %s3404_s20  ;;  %p3410_p13 = scmp.lt.s32.totalorder %s3404_s20, %s3404_s20 }
  0x1f   :  { %p3411_p0 = por %p3410_p13, %p3409_p12 }
  0x21   :  { %p3412_p1 = pnand %p3411_p0, %p3405_p11 }
  0x23   :  { %3415 = shalt.err (!%p3412_p1)
}
  0x24   :  { %s3540_s1 = smov 128   ;;  %s3541_s21 = smov 8  }
  0x25   :  { %61 = dma.hbm_to_vmem [thread:$0]  %s3782_s3, 256, %s56_s12, [#allocation9], %s3540_s1, %s3540_s1, %s3541_s21  }
  0x26   :  { %s3542_s24 = smov [#allocation2]   ;;  %s3543_s26 = smov [#allocation7]  }
  0x27   :  { %s22_s25 = sshll.u32 %s3542_s24, 4  ;;  %s43_s27 = sshll.u32 %s3543_s26, 4  ;;  %s23_s25 = int_to_ptr.vmem [resolvable:$true] %s22_s25  ;;  %s3614_s27 = int_to_ptr.vmem [resolvable:$true] %s43_s27 }
  0x28   :  { %s3416_s30 = scalar_lea.hbm %s3779_s0, 256 }
  0x29   :  { %p3417_p2 = scmp.ne.s32.totalorder %s3779_s0, %s3416_s30  ;;  %p3420_p3 = scmp.lt.u32.totalorder %s3416_s30, %s3779_s0 }
  0x2b   :  { %p3422_p4 = pnand %p3420_p3, %p3417_p2 }
  0x2d   :  { %3425 = shalt.err (!%p3422_p4)
}
  0x2e   :  { %s3426_s3 = scalar_lea.vmem %s23_s25, 256  ;;  %p3431_p6 = scmp.lt.s32.totalorder %s23_s25, %s23_s25 }
  0x2f   :  { %p3427_p5 = scmp.ne.s32.totalorder %s23_s25, %s3426_s3  ;;  %p3432_p7 = scmp.lt.s32.totalorder %s3426_s3, %s3426_s3 }
  0x31   :  { %p3433_p8 = por %p3432_p7, %p3431_p6 }
  0x33   :  { %p3434_p9 = pnand %p3433_p8, %p3427_p5 }
  0x35   :  { %3437 = shalt.err (!%p3434_p9)
}
  0x36   :  { %25 = dma.hbm_to_vmem [thread:$0]  %s3779_s0, 256, %s23_s25, [#allocation3]  }
  0x37   :  { %s3438_s15 = scalar_lea.hbm %s3781_s2, 20480 }
  0x38   :  { %p3439_p10 = scmp.ne.s32.totalorder %s3781_s2, %s3438_s15  ;;  %p3442_p11 = scmp.lt.u32.totalorder %s3438_s15, %s3781_s2 }
  0x3a   :  { %p3444_p12 = pnand %p3442_p11, %p3439_p10 }
  0x3c   :  { %3447 = shalt.err (!%p3444_p12)
}
  0x3d   :  { %s3448_s20 = scalar_lea.vmem %s3614_s27, 20480  ;;  %p3453_p0 = scmp.lt.s32.totalorder %s3614_s27, %s3614_s27 }
  0x3e   :  { %p3449_p13 = scmp.ne.s32.totalorder %s3614_s27, %s3448_s20  ;;  %p3454_p1 = scmp.lt.s32.totalorder %s3448_s20, %s3448_s20 }
  0x40   :  { %p3455_p2 = por %p3454_p1, %p3453_p0 }
  0x42   :  { %p3456_p3 = pnand %p3455_p2, %p3449_p13 }
  0x44   :  { %3459 = shalt.err (!%p3456_p3)
}
  0x45   :  { %s3544_s0 = smov 640   ;;  %s3545_s1 = smov 40  }
  0x46   :  { %49 = dma.hbm_to_vmem [thread:$0]  %s3781_s2, 20480, %s3614_s27, [#allocation6], %s3544_s0, %s3544_s0, %s3545_s1  }
  0x47   :  { %s3546_s23 = smov [#allocation10]   ;;  %s3460_s28 = scalar_lea.hbm %s3783_s4, 32768 }
  0x48   :  { %s67_s24 = sshll.u32 %s3546_s23, 4  ;;  %p3461_p4 = scmp.ne.s32.totalorder %s3783_s4, %s3460_s28  ;;  %s68_s24 = int_to_ptr.vmem [resolvable:$true] %s67_s24 }
  0x49   :  { %p3464_p5 = scmp.lt.u32.totalorder %s3460_s28, %s3783_s4 }
  0x4b   :  { %p3466_p6 = pnand %p3464_p5, %p3461_p4 }
  0x4d   :  { %3469 = shalt.err (!%p3466_p6)
}
  0x4e   :  { %s3470_s9 = scalar_lea.vmem %s68_s24, 32768  ;;  %p3475_p8 = scmp.lt.s32.totalorder %s68_s24, %s68_s24 }
  0x4f   :  { %p3471_p7 = scmp.ne.s32.totalorder %s68_s24, %s3470_s9  ;;  %p3476_p9 = scmp.lt.s32.totalorder %s3470_s9, %s3470_s9 }
  0x51   :  { %p3477_p10 = por %p3476_p9, %p3475_p8 }
  0x53   :  { %p3478_p11 = pnand %p3477_p10, %p3471_p7 }
  0x55   :  { %3481 = shalt.err (!%p3478_p11)
}
  0x56   :  { %s3547_s2 = smov 1024   ;;  %s3548_s27 = smov 64  }
  0x57   :  { %73 = dma.hbm_to_vmem [thread:$0]  %s3783_s4, 32768, %s68_s24, [#allocation9], %s3547_s2, %s3547_s2, %s3548_s27  }
  0x58   :  { %s3549_s11 = smov [#allocation11]   ;;  %s3482_s15 = scalar_lea.hbm %s3784_s5, 448 }
  0x59   :  { %s80_s12 = sshll.u32 %s3549_s11, 4  ;;  %p3483_p12 = scmp.ne.s32.totalorder %s3784_s5, %s3482_s15  ;;  %s81_s12 = int_to_ptr.vmem [resolvable:$true] %s80_s12 }
  0x5a   :  { %p3486_p13 = scmp.lt.u32.totalorder %s3482_s15, %s3784_s5 }
  0x5c   :  { %p3488_p0 = pnand %p3486_p13, %p3483_p12 }
  0x5e   :  { %3491 = shalt.err (!%p3488_p0)
}
  0x5f   :  { %s3492_s20 = scalar_lea.vmem %s81_s12, 448  ;;  %p3497_p2 = scmp.lt.s32.totalorder %s81_s12, %s81_s12 }
  0x60   :  { %p3493_p1 = scmp.ne.s32.totalorder %s81_s12, %s3492_s20  ;;  %p3498_p3 = scmp.lt.s32.totalorder %s3492_s20, %s3492_s20 }
  0x62   :  { %p3499_p4 = por %p3498_p3, %p3497_p2 }
  0x64   :  { %p3500_p5 = pnand %p3499_p4, %p3493_p1 }
  0x66   :  { %3503 = shalt.err (!%p3500_p5)
}
  0x67   :  { %83 = dma.hbm_to_vmem [thread:$0]  %s3784_s5, 448, %s81_s12, [#allocation12]  }
  0x68   :  { %3526 = dma.done.wait [#allocation3], 256  }
  0x69   :  { %3527 = vsyncadd [#allocation3], 4294967040 }
  0x6a   :  { %3528 = dma.done.wait [#allocation6], 26624  }
  0x6b   :  { %3529 = vsyncadd [#allocation6], 4294940672 }
  0x6c   :  { %3530 = dma.done.wait [#allocation9], 33024  }
  0x6d   :  { %3531 = vsyncadd [#allocation9], 4294934272 }
  0x6e   :  { %3532 = dma.done.wait [#allocation12], 448  }
  0x6f   :  { %3533 = vsyncadd [#allocation12], 4294966848  ;;  %v105_v0 = vld [vmem:[#allocation5 + $0x8] sm:$0xff]  ;;  %v107_v1 = vld [vmem:[#allocation5 + $0x18] sm:$0xff]  ;;  %vm164_vm0 = vcmask 523264   ;;  %vm3551_vm1 = vmmov 0  }
  0x70   :  { %v104_v2 = vld [vmem:[#allocation5] sm:$0xff]  ;;  %v3128_v3 = vpack.c.bf16 %v107_v1, %v105_v0  ;;  %v106_v4 = vld [vmem:[#allocation5 + $0x10] sm:$0xff]  ;;  %v109_v5 = vld [vmem:[#allocation5 + $0x28] sm:$0xff]  ;;  %vm665_vm2 = vcmask 130048   ;;  %vm766_vm3 = vcmask 449536   ;;  %vm756_vm4 = vcmask 80896  }
  0x71   :  { %v111_v6 = vld [vmem:[#allocation5 + $0x38] sm:$0xff]  ;;  %v3130_v7 = vpack.c.bf16 %v106_v4, %v104_v2  ;;  %v108_v9 = vld [vmem:[#allocation5 + $0x20] sm:$0xff]  ;;  %v110_v10 = vld [vmem:[#allocation5 + $0x30] sm:$0xff]  ;;  %vm776_vm5 = vcmask 97280   ;;  %vm786_vm6 = vcmask 637952   ;;  %s3553_s5 = smov 55  }
  0x72   :  { %v3132_v8 = vpack.c.bf16 %v111_v6, %v109_v5  ;;  %v113_v11 = vld [vmem:[#allocation5 + $0x48] sm:$0xff]  ;;  %3129 = vmatprep.subr.bf16.mxu0 %v3128_v3  ;;  %v115_v12 = vld [vmem:[#allocation5 + $0x58] sm:$0xff]  ;;  %v3134_v13 = vpack.c.bf16 %v110_v10, %v108_v9  ;;  %v112_v15 = vld [vmem:[#allocation5 + $0x40] sm:$0xff]  ;;  %vm809_vm7 = vcmask 531456   ;;  %s3554_s1 = smov [#allocation13]  }
  0x73   :  { %3131 = vmatpush1.bf16.msra.mxu0 %v3130_v7  ;;  %v3136_v14 = vpack.c.bf16 %v115_v12, %v113_v11  ;;  %v114_v16 = vld [vmem:[#allocation5 + $0x50] sm:$0xff]  ;;  %v117_v17 = vld [vmem:[#allocation5 + $0x68] sm:$0xff]  ;;  %v119_v18 = vld [vmem:[#allocation5 + $0x78] sm:$0xff]  ;;  %s2784_s21 = sshll.u32 %s3554_s1, 4  ;;  %s2785_s21 = int_to_ptr.vmem [resolvable:$true] %s2784_s21 }
  0x74   :  { %3133 = vmatprep.subr.bf16.mxu0 %v3132_v8  ;;  %v3138_v19 = vpack.c.bf16 %v114_v16, %v112_v15  ;;  %v3140_v20 = vpack.c.bf16 %v119_v18, %v117_v17  ;;  %v116_v21 = vld [vmem:[#allocation5 + $0x60] sm:$0xff]  ;;  %v118_v22 = vld [vmem:[#allocation5 + $0x70] sm:$0xff]  ;;  %v121_v23 = vld [vmem:[#allocation5 + $0x88] sm:$0xff]  ;;  %s3504_s22 = scalar_lea.vmem %s2785_s21, 1152  ;;  %p3509_p7 = scmp.lt.s32.totalorder %s2785_s21, %s2785_s21 }
  0x75   :  { %v123_v24 = vld [vmem:[#allocation5 + $0x98] sm:$0xff]  ;;  %v3142_v25 = vpack.c.bf16 %v118_v22, %v116_v21  ;;  %v120_v27 = vld [vmem:[#allocation5 + $0x80] sm:$0xff]  ;;  %v122_v28 = vld [vmem:[#allocation5 + $0x90] sm:$0xff]  ;;  %p3505_p6 = scmp.ne.s32.totalorder %s2785_s21, %s3504_s22  ;;  %p3510_p8 = scmp.lt.s32.totalorder %s3504_s22, %s3504_s22 }
  0x76   :  { %v3144_v26 = vpack.c.bf16 %v123_v24, %v121_v23  ;;  %v125_v29 = vld [vmem:[#allocation5 + $0xa8] sm:$0xff]  ;;  %v127_v30 = vld [vmem:[#allocation5 + $0xb8] sm:$0xff]  ;;  %v124_v31 = vld [vmem:[#allocation5 + $0xa0] sm:$0xff]  ;;  %v3146_v32 = vpack.c.bf16 %v122_v28, %v120_v27 }
  0x77   :  { %3135 = vmatpush1.bf16.msra.mxu0 %v3134_v13  ;;  %v126_v33 = vld [vmem:[#allocation5 + $0xb0] sm:$0xff]  ;;  %v103_v34 = vld [vmem:[#allocation2 + $0x8] sm:$0xff]  ;;  %v258_v35 = vld [vmem:[#allocation7 + $0x8] sm:$0xff]  ;;  %v3148_v36 = vpack.c.bf16 %v127_v30, %v125_v29  ;;  %p3511_p9 = por %p3510_p8, %p3509_p7 }
  0x78   :  { %3137 = vmatprep.subr.bf16.mxu0 %v3136_v14  ;;  %2796 = vmatprep.mubr.msk.f32.mxu0 %vm164_vm0, %v103_v34  ;;  %v263_v37 = vld [vmem:[#allocation7 + $0x30] sm:$0xff]  ;;  %v257_v38 = vld [vmem:[#allocation7] sm:$0xff]  ;;  %v262_v39 = vld [vmem:[#allocation7 + $0x28] sm:$0xff]  ;;  %v3150_v46 = vpack.c.bf16 %v126_v33, %v124_v31 }
  0x79   :  { %v129_v40 = vld [vmem:[#allocation5 + $0xc8] sm:$0xff]  ;;  %v131_v41 = vld [vmem:[#allocation5 + $0xd8] sm:$0xff]  ;;  %v3176_v42 = vpack.c.bf16 %v263_v37, %v258_v35  ;;  %v3178_v43 = vpack.c.bf16 %v262_v39, %v257_v38  ;;  %v273_v45 = vld [vmem:[#allocation7 + $0x80] sm:$0xff]  ;;  %p3512_p10 = pnand %p3511_p9, %p3505_p6 }
  0x7a   :  { %v268_v44 = vld [vmem:[#allocation7 + $0x58] sm:$0xff]  ;;  %v128_v47 = vld [vmem:[#allocation5 + $0xc0] sm:$0xff]  ;;  %v267_v49 = vld [vmem:[#allocation7 + $0x50] sm:$0xff]  ;;  %v3152_v51 = vpack.c.bf16 %v131_v41, %v129_v40 }
  0x7b   :  { %3139 = vmatpush1.bf16.msra.mxu0 %v3138_v19  ;;  %3177 = vmatprep.subr.bf16.mxu1 %v3176_v42  ;;  %v3180_v48 = vpack.c.bf16 %v273_v45, %v268_v44  ;;  %v272_v50 = vld [vmem:[#allocation7 + $0x78] sm:$0xff]  ;;  %v130_v52 = vld [vmem:[#allocation5 + $0xd0] sm:$0xff]  ;;  %v133_v53 = vld [vmem:[#allocation5 + $0xe8] sm:$0xff] }
  0x7c   :  { %3141 = vmatprep.subr.bf16.mxu0 %v3140_v20  ;;  %v135_v54 = vld [vmem:[#allocation5 + $0xf8] sm:$0xff]  ;;  %3179 = vmatpush1.bf16.msra.mxu1 %v3178_v43  ;;  %v3182_v55 = vpack.c.bf16 %v272_v50, %v267_v49  ;;  %v278_v56 = vld [vmem:[#allocation7 + $0xa8] sm:$0xff]  ;;  %v283_v57 = vld [vmem:[#allocation7 + $0xd0] sm:$0xff]  ;;  %v3154_v61 = vpack.c.bf16 %v130_v52, %v128_v47 }
  0x7d   :  { %3181 = vmatprep.subr.bf16.mxu1 %v3180_v48  ;;  %v277_v58 = vld [vmem:[#allocation7 + $0xa0] sm:$0xff]  ;;  %v3184_v59 = vpack.c.bf16 %v283_v57, %v278_v56  ;;  %v282_v60 = vld [vmem:[#allocation7 + $0xc8] sm:$0xff]  ;;  %v288_v63 = vld [vmem:[#allocation7 + $0xf8] sm:$0xff]  ;;  %v3156_v0 = vpack.c.bf16 %v135_v54, %v133_v53 }
  0x7e   :  { %v132_v62 = vld [vmem:[#allocation5 + $0xe0] sm:$0xff]  ;;  %v134_v1 = vld [vmem:[#allocation5 + $0xf0] sm:$0xff]  ;;  %v137_v2 = vld [vmem:[#allocation5 + $0x108] sm:$0xff]  ;;  %v3186_v3 = vpack.c.bf16 %v282_v60, %v277_v58 }
  0x7f   :  { %3143 = vmatpush1.bf16.msra.mxu0 %v3142_v25  ;;  %v293_v4 = vld [vmem:[#allocation7 + $0x120] sm:$0xff]  ;;  %v139_v5 = vld [vmem:[#allocation5 + $0x118] sm:$0xff]  ;;  %v287_v7 = vld [vmem:[#allocation7 + $0xf0] sm:$0xff]  ;;  %v3158_v11 = vpack.c.bf16 %v134_v1, %v132_v62 }
  0x80   :  { %3145 = vmatprep.subr.bf16.mxu0 %v3144_v26  ;;  %3183 = vmatpush1.bf16.msra.mxu1 %v3182_v55  ;;  %v3188_v6 = vpack.c.bf16 %v293_v4, %v288_v63  ;;  %v292_v8 = vld [vmem:[#allocation7 + $0x118] sm:$0xff]  ;;  %v298_v9 = vld [vmem:[#allocation7 + $0x148] sm:$0xff]  ;;  %v303_v10 = vld [vmem:[#allocation7 + $0x170] sm:$0xff]  ;;  %v3160_v12 = vpack.c.bf16 %v139_v5, %v137_v2 }
  0x81   :  { %3185 = vmatprep.subr.bf16.mxu1 %v3184_v59  ;;  %v136_v13 = vld [vmem:[#allocation5 + $0x100] sm:$0xff]  ;;  %v138_v14 = vld [vmem:[#allocation5 + $0x110] sm:$0xff]  ;;  %v141_v15 = vld [vmem:[#allocation5 + $0x128] sm:$0xff]  ;;  %v3190_v16 = vpack.c.bf16 %v292_v8, %v287_v7  ;;  %v3192_v18 = vpack.c.bf16 %v303_v10, %v298_v9 }
  0x82   :  { %v143_v17 = vld [vmem:[#allocation5 + $0x138] sm:$0xff]  ;;  %v297_v19 = vld [vmem:[#allocation7 + $0x140] sm:$0xff]  ;;  %v302_v20 = vld [vmem:[#allocation7 + $0x168] sm:$0xff]  ;;  %v3162_v23 = vpack.c.bf16 %v138_v14, %v136_v13 }
  0x83   :  { %3147 = vmatpush1.bf16.msra.mxu0 %v3146_v32  ;;  %v308_v21 = vld [vmem:[#allocation7 + $0x198] sm:$0xff]  ;;  %v313_v22 = vld [vmem:[#allocation7 + $0x1c0] sm:$0xff]  ;;  %v3164_v24 = vpack.c.bf16 %v143_v17, %v141_v15  ;;  %v142_v26 = vld [vmem:[#allocation5 + $0x130] sm:$0xff]  ;;  %v3194_v28 = vpack.c.bf16 %v302_v20, %v297_v19 }
  0x84   :  { %3149 = vmatprep.subr.bf16.mxu0 %v3148_v36  ;;  %3187 = vmatpush1.bf16.msra.mxu1 %v3186_v3  ;;  %v140_v25 = vld [vmem:[#allocation5 + $0x120] sm:$0xff]  ;;  %v145_v27 = vld [vmem:[#allocation5 + $0x148] sm:$0xff]  ;;  %v147_v29 = vld [vmem:[#allocation5 + $0x158] sm:$0xff]  ;;  %v3196_v30 = vpack.c.bf16 %v313_v22, %v308_v21 }
  0x85   :  { %3189 = vmatprep.subr.bf16.mxu1 %v3188_v6  ;;  %v307_v31 = vld [vmem:[#allocation7 + $0x190] sm:$0xff]  ;;  %v312_v32 = vld [vmem:[#allocation7 + $0x1b8] sm:$0xff]  ;;  %v318_v33 = vld [vmem:[#allocation7 + $0x1e8] sm:$0xff]  ;;  %v3166_v35 = vpack.c.bf16 %v142_v26, %v140_v25  ;;  %v3168_v36 = vpack.c.bf16 %v147_v29, %v145_v27 }
  0x86   :  { %v323_v34 = vld [vmem:[#allocation7 + $0x210] sm:$0xff]  ;;  %v144_v37 = vld [vmem:[#allocation5 + $0x140] sm:$0xff]  ;;  %v149_v39 = vld [vmem:[#allocation5 + $0x168] sm:$0xff]  ;;  %v3198_v40 = vpack.c.bf16 %v312_v32, %v307_v31 }
  0x87   :  { %3151 = vmatpush1.bf16.msra.mxu0 %v3150_v46  ;;  %v146_v38 = vld [vmem:[#allocation5 + $0x150] sm:$0xff]  ;;  %v151_v41 = vld [vmem:[#allocation5 + $0x178] sm:$0xff]  ;;  %v3200_v42 = vpack.c.bf16 %v323_v34, %v318_v33  ;;  %v317_v43 = vld [vmem:[#allocation7 + $0x1e0] sm:$0xff] }
  0x88   :  { %3153 = vmatprep.subr.bf16.mxu0 %v3152_v51  ;;  %3191 = vmatpush1.bf16.msra.mxu1 %v3190_v16  ;;  %v322_v44 = vld [vmem:[#allocation7 + $0x208] sm:$0xff]  ;;  %v328_v45 = vld [vmem:[#allocation7 + $0x238] sm:$0xff]  ;;  %v333_v46 = vld [vmem:[#allocation7 + $0x260] sm:$0xff]  ;;  %v3170_v47 = vpack.c.bf16 %v146_v38, %v144_v37  ;;  %v3172_v48 = vpack.c.bf16 %v151_v41, %v149_v39 }
  0x89   :  { %3193 = vmatprep.subr.bf16.mxu1 %v3192_v18  ;;  %v148_v49 = vld [vmem:[#allocation5 + $0x160] sm:$0xff]  ;;  %v150_v50 = vld [vmem:[#allocation5 + $0x170] sm:$0xff]  ;;  %v260_v51 = vld [vmem:[#allocation7 + $0x18] sm:$0xff]  ;;  %v3202_v52 = vpack.c.bf16 %v322_v44, %v317_v43  ;;  %v3204_v54 = vpack.c.bf16 %v333_v46, %v328_v45 }
  0x8a   :  { %v265_v53 = vld [vmem:[#allocation7 + $0x40] sm:$0xff]  ;;  %v327_v55 = vld [vmem:[#allocation7 + $0x230] sm:$0xff]  ;;  %v332_v56 = vld [vmem:[#allocation7 + $0x258] sm:$0xff]  ;;  %v3174_v59 = vpack.c.bf16 %v150_v50, %v148_v49 }
  0x8b   :  { %3155 = vmatpush1.bf16.msra.mxu0 %v3154_v61  ;;  %v338_v57 = vld [vmem:[#allocation7 + $0x288] sm:$0xff]  ;;  %v343_v58 = vld [vmem:[#allocation7 + $0x2b0] sm:$0xff]  ;;  %v3240_v60 = vpack.c.bf16 %v265_v53, %v260_v51  ;;  %v264_v62 = vld [vmem:[#allocation7 + $0x38] sm:$0xff] }
  0x8c   :  { %3157 = vmatprep.subr.bf16.mxu0 %v3156_v0  ;;  %3195 = vmatpush1.bf16.msra.mxu1 %v3194_v28  ;;  %v259_v61 = vld [vmem:[#allocation7 + $0x10] sm:$0xff]  ;;  %v270_v63 = vld [vmem:[#allocation7 + $0x68] sm:$0xff]  ;;  %v3206_v0 = vpack.c.bf16 %v332_v56, %v327_v55  ;;  %v3208_v2 = vpack.c.bf16 %v343_v58, %v338_v57  ;;  %v337_v3 = vld [vmem:[#allocation7 + $0x280] sm:$0xff] }
  0x8d   :  { %3197 = vmatprep.subr.bf16.mxu1 %v3196_v30  ;;  %v275_v1 = vld [vmem:[#allocation7 + $0x90] sm:$0xff]  ;;  %v342_v4 = vld [vmem:[#allocation7 + $0x2a8] sm:$0xff]  ;;  %v348_v5 = vld [vmem:[#allocation7 + $0x2d8] sm:$0xff]  ;;  %v3242_v8 = vpack.c.bf16 %v264_v62, %v259_v61 }
  0x8e   :  { %v353_v6 = vld [vmem:[#allocation7 + $0x300] sm:$0xff]  ;;  %v102_v7 = vld [vmem:[#allocation2] sm:$0xff]  ;;  %v3244_v9 = vpack.c.bf16 %v275_v1, %v270_v63  ;;  %v3210_v13 = vpack.c.bf16 %v342_v4, %v337_v3  ;;  %v352_v17 = vld [vmem:[#allocation7 + $0x2f8] sm:$0xff] }
  0x8f   :  { %3159 = vmatpush1.bf16.msra.mxu0 %v3158_v11  ;;  %v269_v10 = vld [vmem:[#allocation7 + $0x60] sm:$0xff]  ;;  %v274_v11 = vld [vmem:[#allocation7 + $0x88] sm:$0xff]  ;;  %v3212_v15 = vpack.c.bf16 %v353_v6, %v348_v5  ;;  %v347_v16 = vld [vmem:[#allocation7 + $0x2d0] sm:$0xff] }
  0x90   :  { %3161 = vmatprep.subr.bf16.mxu0 %v3160_v12  ;;  %3199 = vmatpush1.bf16.msra.mxu1 %v3198_v40  ;;  %v280_v12 = vld [vmem:[#allocation7 + $0xb8] sm:$0xff]  ;;  %v285_v14 = vld [vmem:[#allocation7 + $0xe0] sm:$0xff]  ;;  %v358_v18 = vld [vmem:[#allocation7 + $0x328] sm:$0xff]  ;;  %v3246_v20 = vpack.c.bf16 %v274_v11, %v269_v10  ;;  %v3214_v25 = vpack.c.bf16 %v352_v17, %v347_v16 }
  0x91   :  { %3201 = vmatprep.subr.bf16.mxu1 %v3200_v42  ;;  %v363_v19 = vld [vmem:[#allocation7 + $0x350] sm:$0xff]  ;;  %v3248_v21 = vpack.c.bf16 %v285_v14, %v280_v12  ;;  %v357_v28 = vld [vmem:[#allocation7 + $0x320] sm:$0xff]  ;;  %v362_v29 = vld [vmem:[#allocation7 + $0x348] sm:$0xff] }
  0x92   :  { %v279_v22 = vld [vmem:[#allocation7 + $0xb0] sm:$0xff]  ;;  %v3216_v27 = vpack.c.bf16 %v363_v19, %v358_v18  ;;  %v368_v30 = vld [vmem:[#allocation7 + $0x378] sm:$0xff]  ;;  %v373_v31 = vld [vmem:[#allocation7 + $0x3a0] sm:$0xff]  ;;  %v3218_v37 = vpack.c.bf16 %v362_v29, %v357_v28 }
  0x93   :  { %3163 = vmatpush1.bf16.msra.mxu0 %v3162_v23  ;;  %v284_v23 = vld [vmem:[#allocation7 + $0xd8] sm:$0xff]  ;;  %v295_v26 = vld [vmem:[#allocation7 + $0x130] sm:$0xff]  ;;  %v289_v34 = vld [vmem:[#allocation7 + $0x100] sm:$0xff]  ;;  %v3220_v39 = vpack.c.bf16 %v373_v31, %v368_v30 }
  0x94   :  { %3165 = vmatprep.subr.bf16.mxu0 %v3164_v24  ;;  %3203 = vmatpush1.bf16.msra.mxu1 %v3202_v52  ;;  %v290_v24 = vld [vmem:[#allocation7 + $0x108] sm:$0xff]  ;;  %v3250_v32 = vpack.c.bf16 %v284_v23, %v279_v22  ;;  %v305_v38 = vld [vmem:[#allocation7 + $0x180] sm:$0xff]  ;;  %v367_v40 = vld [vmem:[#allocation7 + $0x370] sm:$0xff] }
  0x95   :  { %3205 = vmatprep.subr.bf16.mxu1 %v3204_v54  ;;  %v3252_v33 = vpack.c.bf16 %v295_v26, %v290_v24  ;;  %v372_v41 = vld [vmem:[#allocation7 + $0x398] sm:$0xff]  ;;  %v378_v42 = vld [vmem:[#allocation7 + $0x3c8] sm:$0xff]  ;;  %v383_v43 = vld [vmem:[#allocation7 + $0x3f0] sm:$0xff] }
  0x96   :  { %v299_v46 = vld [vmem:[#allocation7 + $0x150] sm:$0xff]  ;;  %v310_v49 = vld [vmem:[#allocation7 + $0x1a8] sm:$0xff]  ;;  %v3224_v51 = vpack.c.bf16 %v383_v43, %v378_v42  ;;  %v309_v54 = vld [vmem:[#allocation7 + $0x1a0] sm:$0xff] }
  0x97   :  { %3167 = vmatpush1.bf16.msra.mxu0 %v3166_v35  ;;  %v294_v35 = vld [vmem:[#allocation7 + $0x128] sm:$0xff]  ;;  %v315_v50 = vld [vmem:[#allocation7 + $0x1d0] sm:$0xff]  ;;  %v320_v56 = vld [vmem:[#allocation7 + $0x1f8] sm:$0xff] }
  0x98   :  { %3169 = vmatprep.subr.bf16.mxu0 %v3168_v36  ;;  %3207 = vmatpush1.bf16.msra.mxu1 %v3206_v0  ;;  %v300_v36 = vld [vmem:[#allocation7 + $0x158] sm:$0xff]  ;;  %v3254_v44 = vpack.c.bf16 %v294_v35, %v289_v34  ;;  %v3260_v53 = vpack.c.bf16 %v315_v50, %v310_v49  ;;  %v314_v55 = vld [vmem:[#allocation7 + $0x1c8] sm:$0xff]  ;;  %v325_v57 = vld [vmem:[#allocation7 + $0x220] sm:$0xff] }
  0x99   :  { %3209 = vmatprep.subr.bf16.mxu1 %v3208_v2  ;;  %v3256_v45 = vpack.c.bf16 %v305_v38, %v300_v36  ;;  %v3262_v58 = vpack.c.bf16 %v314_v55, %v309_v54  ;;  %v324_v61 = vld [vmem:[#allocation7 + $0x218] sm:$0xff]  ;;  %v330_v62 = vld [vmem:[#allocation7 + $0x248] sm:$0xff]  ;;  %v335_v63 = vld [vmem:[#allocation7 + $0x270] sm:$0xff] }
  0x9a   :  { %v3268_v1 = vpack.c.bf16 %v335_v63, %v330_v62  ;;  %v329_v2 = vld [vmem:[#allocation7 + $0x240] sm:$0xff]  ;;  %v334_v3 = vld [vmem:[#allocation7 + $0x268] sm:$0xff]  ;;  %v340_v4 = vld [vmem:[#allocation7 + $0x298] sm:$0xff] }
  0x9b   :  { %3171 = vmatpush1.bf16.msra.mxu0 %v3170_v47  ;;  %v304_v47 = vld [vmem:[#allocation7 + $0x178] sm:$0xff]  ;;  %v345_v5 = vld [vmem:[#allocation7 + $0x2c0] sm:$0xff]  ;;  %v3270_v6 = vpack.c.bf16 %v334_v3, %v329_v2  ;;  %v350_v10 = vld [vmem:[#allocation7 + $0x2e8] sm:$0xff] }
  0x9c   :  { %3173 = vmatprep.subr.bf16.mxu0 %v3172_v48  ;;  %3211 = vmatpush1.bf16.msra.mxu1 %v3210_v13  ;;  %v3222_v48 = vpack.c.bf16 %v372_v41, %v367_v40  ;;  %v3258_v52 = vpack.c.bf16 %v304_v47, %v299_v46  ;;  %v355_v11 = vld [vmem:[#allocation7 + $0x310] sm:$0xff]  ;;  %v349_v14 = vld [vmem:[#allocation7 + $0x2e0] sm:$0xff]  ;;  %v360_v16 = vld [vmem:[#allocation7 + $0x338] sm:$0xff] }
  0x9d   :  { %3213 = vmatprep.subr.bf16.mxu1 %v3212_v15  ;;  %v3276_v13 = vpack.c.bf16 %v355_v11, %v350_v10  ;;  %v354_v15 = vld [vmem:[#allocation7 + $0x308] sm:$0xff]  ;;  %v365_v17 = vld [vmem:[#allocation7 + $0x360] sm:$0xff]  ;;  %v375_v23 = vld [vmem:[#allocation7 + $0x3b0] sm:$0xff] }
  0x9e   :  { %v3278_v18 = vpack.c.bf16 %v354_v15, %v349_v14  ;;  %v3280_v19 = vpack.c.bf16 %v365_v17, %v360_v16  ;;  %v370_v22 = vld [vmem:[#allocation7 + $0x388] sm:$0xff]  ;;  %v369_v26 = vld [vmem:[#allocation7 + $0x380] sm:$0xff]  ;;  %v380_v31 = vld [vmem:[#allocation7 + $0x3d8] sm:$0xff] }
  0x9f   :  { %3175 = vmatpush1.bf16.msra.mxu0 %v3174_v59  ;;  %v3264_v59 = vpack.c.bf16 %v325_v57, %v320_v56  ;;  %v377_v29 = vld [vmem:[#allocation7 + $0x3c0] sm:$0xff]  ;;  %v382_v30 = vld [vmem:[#allocation7 + $0x3e8] sm:$0xff]  ;;  %v379_v34 = vld [vmem:[#allocation7 + $0x3d0] sm:$0xff] }
  0xa0   :  { %3241 = vmatprep.subr.bf16.mxu0 %v3240_v60  ;;  %3215 = vmatpush1.bf16.msra.mxu1 %v3214_v25  ;;  %v319_v60 = vld [vmem:[#allocation7 + $0x1f0] sm:$0xff]  ;;  %v3284_v25 = vpack.c.bf16 %v375_v23, %v370_v22  ;;  %v384_v35 = vld [vmem:[#allocation7 + $0x3f8] sm:$0xff]  ;;  %v390_v43 = vld [vmem:[#allocation7 + $0x428] sm:$0xff] }
  0xa1   :  { %3217 = vmatprep.subr.bf16.mxu1 %v3216_v27  ;;  %v3266_v0 = vpack.c.bf16 %v324_v61, %v319_v60  ;;  %v374_v27 = vld [vmem:[#allocation7 + $0x3a8] sm:$0xff]  ;;  %v388_v38 = vld [vmem:[#allocation7 + $0x418] sm:$0xff]  ;;  %v387_v41 = vld [vmem:[#allocation7 + $0x410] sm:$0xff] }
  0xa2   :  { %233 = vmatmul.mubr.f32.vlgmr.msra.gmra.mrb[0].mxu0 %v102_v7  ;;  %v3272_v7 = vpack.c.bf16 %v345_v5, %v340_v4  ;;  %v3286_v28 = vpack.c.bf16 %v374_v27, %v369_v26  ;;  %v392_v42 = vld [vmem:[#allocation7 + $0x438] sm:$0xff]  ;;  %v389_v46 = vld [vmem:[#allocation7 + $0x420] sm:$0xff]  ;;  %v394_v47 = vld [vmem:[#allocation7 + $0x448] sm:$0xff] }
  0xa3   :  { %3243 = vmatpush1.bf16.msra.mxu0 %v3242_v8  ;;  %v339_v8 = vld [vmem:[#allocation7 + $0x290] sm:$0xff]  ;;  %v3294_v49 = vpack.c.bf16 %v394_v47, %v389_v46  ;;  %v398_v50 = vld [vmem:[#allocation7 + $0x468] sm:$0xff]  ;;  %v400_v55 = vld [vmem:[#allocation7 + $0x478] sm:$0xff] }
  0xa4   :  { %3245 = vmatprep.subr.bf16.mxu0 %v3244_v9  ;;  %3219 = vmatpush1.bf16.msra.mxu1 %v3218_v37  ;;  %v344_v9 = vld [vmem:[#allocation7 + $0x2b8] sm:$0xff]  ;;  %v3290_v37 = vpack.c.bf16 %v384_v35, %v379_v34  ;;  %v402_v54 = vld [vmem:[#allocation7 + $0x488] sm:$0xff]  ;;  %v405_v57 = vld [vmem:[#allocation7 + $0x4a0] sm:$0xff] }
  0xa5   :  { %3221 = vmatprep.subr.bf16.mxu1 %v3220_v39  ;;  %v3274_v12 = vpack.c.bf16 %v344_v9, %v339_v8  ;;  %v393_v39 = vld [vmem:[#allocation7 + $0x440] sm:$0xff]  ;;  %v3296_v60 = vpack.c.bf16 %v405_v57, %v400_v55  ;;  %v408_v62 = vld [vmem:[#allocation7 + $0x4b8] sm:$0xff]  ;;  %v410_v3 = vld [vmem:[#allocation7 + $0x4c8] sm:$0xff] }
  0xa6   :  { %v3228_v40 = vpack.c.bf16 %v393_v39, %v388_v38  ;;  %v413_v63 = vld [vmem:[#allocation7 + $0x4e0] sm:$0xff]  ;;  %v412_v2 = vld [vmem:[#allocation7 + $0x4d8] sm:$0xff]  ;;  %v415_v4 = vld [vmem:[#allocation7 + $0x4f0] sm:$0xff] }
  0xa7   :  { %3247 = vmatpush1.bf16.msra.mxu0 %v3246_v20  ;;  %v359_v20 = vld [vmem:[#allocation7 + $0x330] sm:$0xff]  ;;  %v414_v8 = vld [vmem:[#allocation7 + $0x4e8] sm:$0xff]  ;;  %v341_v10 = vld [vmem:[#allocation7 + $0x2a0] sm:$0xff] }
  0xa8   :  { %3249 = vmatprep.subr.bf16.mxu0 %v3248_v21  ;;  %3223 = vmatpush1.bf16.msra.mxu1 %v3222_v48  ;;  %v364_v21 = vld [vmem:[#allocation7 + $0x358] sm:$0xff]  ;;  %v346_v11 = vld [vmem:[#allocation7 + $0x2c8] sm:$0xff]  ;;  %v152_v17 = vld [vmem:[#allocation11] sm:$0x3] }
  0xa9   :  { %3225 = vmatprep.subr.bf16.mxu1 %v3224_v51  ;;  %v3282_v24 = vpack.c.bf16 %v364_v21, %v359_v20  ;;  %v403_v51 = vld [vmem:[#allocation7 + $0x490] sm:$0xff]  ;;  %v261_v27 = vld [vmem:[#allocation7 + $0x20] sm:$0xff]  ;;  %v366_v39 = vld [vmem:[#allocation7 + $0x368] sm:$0xff] }
  0xaa   :  { %v361_v38 = vld [vmem:[#allocation7 + $0x340] sm:$0xff]  ;;  %v306_v55 = vld [vmem:[#allocation7 + $0x188] sm:$0xff]  ;;  %v396_v57 = vld [vmem:[#allocation7 + $0x458] sm:$0xff] }
  0xab   :  { %3251 = vmatpush1.bf16.msra.mxu0 %v3250_v32  ;;  %v3226_v32 = vpack.c.bf16 %v382_v30, %v377_v29  ;;  %v2798_v29 = vld [vmem:[#allocation11 + $0x3] ss:$0 sm:$0xff]  ;;  %vm3710_vm8 = vmpackc.low %vm809_vm7, %vm809_vm7 }
  0xac   :  { %3253 = vmatprep.subr.bf16.mxu0 %v3252_v33  ;;  %v385_v33 = vld [vmem:[#allocation7 + $0x400] sm:$0xff]  ;;  %v351_v30 = vld [vmem:[#allocation7 + $0x2f0] sm:$0xff] }
  0xad   :  { %v3288_v36 = vpack.c.bf16 %v385_v33, %v380_v31  ;;  %3227 = vmatpush1.bf16.msra.mxu1 %v3226_v32  ;;  %v356_v31 = vld [vmem:[#allocation7 + $0x318] sm:$0xff] }
  0xae   :  { %3229 = vmatprep.subr.bf16.mxu1 %v3228_v40  ;;  %v3308_v35 = vpack.c.bf16 %v356_v31, %v351_v30 }
  0xaf   :  { %3255 = vmatpush1.bf16.msra.mxu0 %v3254_v44  ;;  %v3230_v44 = vpack.c.bf16 %v392_v42, %v387_v41  ;;  %v3312_v41 = vpack.c.bf16 %v366_v39, %v361_v38  ;;  %v281_v42 = vld [vmem:[#allocation7 + $0xc0] sm:$0xff] }
  0xb0   :  { %3257 = vmatprep.subr.bf16.mxu0 %v3256_v45  ;;  %v395_v45 = vld [vmem:[#allocation7 + $0x450] sm:$0xff] }
  0xb1   :  { %v3292_v48 = vpack.c.bf16 %v395_v45, %v390_v43  ;;  %3231 = vmatpush1.bf16.msra.mxu1 %v3230_v44  ;;  %v286_v43 = vld [vmem:[#allocation7 + $0xe8] sm:$0xff]  ;;  %v371_v44 = vld [vmem:[#allocation7 + $0x390] sm:$0xff]  ;;  %v376_v45 = vld [vmem:[#allocation7 + $0x3b8] sm:$0xff] }
  0xb2   :  { %v3314_v46 = vpack.c.bf16 %v286_v43, %v281_v42  ;;  %v3316_v47 = vpack.c.bf16 %v376_v45, %v371_v44 }
  0xb3   :  { %3259 = vmatpush1.bf16.msra.mxu0 %v3258_v52  ;;  %v3232_v52 = vpack.c.bf16 %v403_v51, %v398_v50  ;;  %v381_v50 = vld [vmem:[#allocation7 + $0x3e0] sm:$0xff]  ;;  %v386_v51 = vld [vmem:[#allocation7 + $0x408] sm:$0xff] }
  0xb4   :  { %3261 = vmatprep.subr.bf16.mxu0 %v3260_v53  ;;  %v397_v53 = vld [vmem:[#allocation7 + $0x460] sm:$0xff] }
  0xb5   :  { %v3234_v56 = vpack.c.bf16 %v402_v54, %v397_v53  ;;  %3233 = vmatprep.subr.bf16.mxu1 %v3232_v52  ;;  %v3320_v53 = vpack.c.bf16 %v386_v51, %v381_v50  ;;  %v301_v54 = vld [vmem:[#allocation7 + $0x160] sm:$0xff] }
  0xb7   :  { %3263 = vmatpush1.bf16.msra.mxu0 %v3262_v58  ;;  %v399_v58 = vld [vmem:[#allocation7 + $0x470] sm:$0xff]  ;;  %3235 = vmatpush1.bf16.msra.mxu1 %v3234_v56 }
  0xb8   :  { %3265 = vmatprep.subr.bf16.mxu0 %v3264_v59  ;;  %v404_v59 = vld [vmem:[#allocation7 + $0x498] sm:$0xff]  ;;  %v391_v56 = vld [vmem:[#allocation7 + $0x430] sm:$0xff] }
  0xb9   :  { %v3298_v61 = vpack.c.bf16 %v404_v59, %v399_v58  ;;  %v3322_v58 = vpack.c.bf16 %v306_v55, %v301_v54  ;;  %v3324_v59 = vpack.c.bf16 %v396_v57, %v391_v56 }
  0xbb   :  { %3267 = vmatpush1.bf16.msra.mxu0 %v3266_v0  ;;  %v407_v0 = vld [vmem:[#allocation7 + $0x4b0] sm:$0xff] }
  0xbc   :  { %3269 = vmatprep.subr.bf16.mxu0 %v3268_v1  ;;  %v3236_v1 = vpack.c.bf16 %v413_v63, %v408_v62  ;;  %v3238_v5 = vpack.c.bf16 %v412_v2, %v407_v0  ;;  %v401_v62 = vld [vmem:[#allocation7 + $0x480] sm:$0xff]  ;;  %v406_v63 = vld [vmem:[#allocation7 + $0x4a8] sm:$0xff] }
  0xbd   :  { %v321_v2 = vld [vmem:[#allocation7 + $0x200] sm:$0xff] }
  0xbe   :  { %3237 = vmatprep.subr.bf16.mxu1 %v3236_v1  ;;  %v3328_v1 = vpack.c.bf16 %v406_v63, %v401_v62 }
  0xbf   :  { %3271 = vmatpush1.bf16.msra.mxu0 %v3270_v6  ;;  %v3300_v6 = vpack.c.bf16 %v415_v4, %v410_v3  ;;  %3239 = vmatpush1.bf16.msra.mxu1 %v3238_v5  ;;  %v326_v3 = vld [vmem:[#allocation7 + $0x228] sm:$0xff]  ;;  %v411_v4 = vld [vmem:[#allocation7 + $0x4d0] sm:$0xff]  ;;  %v416_v5 = vld [vmem:[#allocation7 + $0x4f8] sm:$0xff] }
  0xc0   :  { %3273 = vmatprep.subr.bf16.mxu0 %v3272_v7  ;;  %v409_v7 = vld [vmem:[#allocation7 + $0x4c0] sm:$0xff] }
  0xc1   :  { %v3302_v9 = vpack.c.bf16 %v414_v8, %v409_v7  ;;  %v3332_v7 = vpack.c.bf16 %v416_v5, %v411_v4  ;;  %v331_v8 = vld [vmem:[#allocation7 + $0x250] sm:$0xff]  ;;  %v814_v4 = vld [vmem:[#allocation10 + $0x8] sm:$0xff] }
  0xc3   :  { %3275 = vmatpush1.bf16.msra.mxu0 %v3274_v12  ;;  %v3304_v12 = vpack.c.bf16 %v346_v11, %v341_v10  ;;  %v3550_v11 = vmov 0.0|0.0  }
  0xc4   :  { %3277 = vmatprep.subr.bf16.mxu0 %v3276_v13  ;;  %v154_v13 = vlaneseq }
  0xc5   :  { %3305 = vmatprep.subr.bf16.mxu1 %v3304_v12  ;;  %v656_v12 = vld [vmem:[#allocation8] sm:$0xff] }
  0xc6   :  { %v3669_v14 = vshrl.u32 %v154_v13, 7  ;;  %v657_v13 = vld [vmem:[#allocation8 + $0x8] sm:$0xff] }
  0xc7   :  { %3279 = vmatpush1.bf16.msra.mxu0 %v3278_v18 }
  0xc8   :  { %3281 = vmatprep.subr.bf16.mxu0 %v3280_v19  ;;  %v3672_v15 = vsub.s32 0, %v3669_v14  ;;  %v3675_v16 = vsub.s32 1, %v3669_v14 }
  0xca   :  { %v157_v18 = vrot.slane %v152_v17, %v3672_v15  ;;  %v161_v19 = vrot.slane %v152_v17, %v3675_v16  ;;  %v3337_v17 = vpack.c.bf16 %v657_v13, %v656_v12 }
  0xcb   :  { %3283 = vmatpush1.bf16.msra.mxu0 %v3282_v24 }
  0xcc   :  { %3285 = vmatprep.subr.bf16.mxu0 %v3284_v25  ;;  %v2797_v25 = vld [vmem:[#allocation11 + $0x2] ss:$0 sm:$0xff] }
  0xcf   :  { %3287 = vmatpush1.bf16.msra.mxu0 %v3286_v28  ;;  %v266_v28 = vld [vmem:[#allocation7 + $0x48] sm:$0xff] }
  0xd0   :  { %3289 = vmatprep.subr.bf16.mxu0 %v3288_v36  ;;  %v3306_v32 = vpack.c.bf16 %v266_v28, %v261_v27  ;;  %v271_v36 = vld [vmem:[#allocation7 + $0x70] sm:$0xff] }
  0xd3   :  { %3291 = vmatpush1.bf16.msra.mxu0 %v3290_v37  ;;  %v276_v37 = vld [vmem:[#allocation7 + $0x98] sm:$0xff] }
  0xd4   :  { %3293 = vmatprep.subr.bf16.mxu0 %v3292_v48  ;;  %v3310_v40 = vpack.c.bf16 %v276_v37, %v271_v36  ;;  %v291_v48 = vld [vmem:[#allocation7 + $0x110] sm:$0xff]  ;;  %v3693_v37 = vsub.s32 4, %v3669_v14 }
  0xd7   :  { %3295 = vmatpush1.bf16.msra.mxu0 %v3294_v49  ;;  %v296_v49 = vld [vmem:[#allocation7 + $0x138] sm:$0xff] }
  0xd8   :  { %3297 = vmatprep.subr.bf16.mxu0 %v3296_v60  ;;  %v3318_v52 = vpack.c.bf16 %v296_v49, %v291_v48  ;;  %v311_v60 = vld [vmem:[#allocation7 + $0x1b0] sm:$0xff] }
  0xdb   :  { %3299 = vmatpush1.bf16.msra.mxu0 %v3298_v61  ;;  %v316_v61 = vld [vmem:[#allocation7 + $0x1d8] sm:$0xff] }
  0xdc   :  { %3301 = vmatprep.subr.bf16.mxu0 %v3300_v6  ;;  %v3326_v0 = vpack.c.bf16 %v316_v61, %v311_v60  ;;  %v3330_v6 = vpack.c.bf16 %v326_v3, %v321_v2  ;;  %v813_v2 = vld [vmem:[#allocation10] sm:$0xff] }
  0xdd   :  { %v821_v3 = vld [vmem:[#allocation10 + $0x40] sm:$0xff] }
  0xdf   :  { %3303 = vmatpush1.bf16.msra.mxu0 %v3302_v9  ;;  %v336_v9 = vld [vmem:[#allocation7 + $0x278] sm:$0xff] }
  0xe0   :  { %v3334_v10 = vpack.c.bf16 %v336_v9, %v331_v8  ;;  %v822_v8 = vld [vmem:[#allocation10 + $0x48] sm:$0xff]  ;;  %v829_v9 = vld [vmem:[#allocation10 + $0x80] sm:$0xff] }
  0xe1   :  { %v2805_v12 = vcombine.low %v814_v4, %v822_v8  ;;  %v2806_v13 = vcombine.high %v814_v4, %v822_v8  ;;  %v926_v4 = vld [vmem:[#allocation10 + $0x388] sm:$0xff] }
  0xe3   :  { %2474 = vmatprep.subr.bf16.mxu0 %v2806_v13  ;;  %v942_v13 = vld [vmem:[#allocation10 + $0x408] sm:$0xff] }
 0x175   :  { %v234_v20 = vpop.f32.mrb[0].mxu0 }
 0x176   :  { %v236_v21 = vpop.f32.mrb[1].mxu0  ;;  %v235_v22 = vadd.f32 %v234_v20, %v157_v18  ;;  %v3552_v18 = vmov 0.0   ;;  %v417_v20 = vld [vmem:[#allocation11 + $0x4] sm:$0x1f] }
 0x177   :  { %v237_v23 = vadd.f32 %v236_v21, %v161_v19  ;;  %v3680_v19 = vsub.s32 2, %v3669_v14  ;;  %v3683_v21 = vsub.s32 3, %v3669_v14  ;;  %v438_v39 = vrot.slane %v417_v20, %v3693_v37 }
 0x178   :  { %v239_v24 = vmax.f32 %v235_v22, 0.0  ;;  %v422_v22 = vrot.slane %v417_v20, %v3672_v15 }
 0x179   :  { %3358 = vtanh.f32 %v237_v23  ;;  %v430_v23 = vrot.slane %v417_v20, %v3680_v19  ;;  %v434_v27 = vrot.slane %v417_v20, %v3683_v21 }
 0x17a   :  { %v247_v26 = vmul.f32 %v2797_v25, %v239_v24  ;;  %v426_v24 = vrot.slane %v417_v20, %v3675_v16  ;;  %v845_v20 = vld [vmem:[#allocation10 + $0x100] sm:$0xff] }
 0x17c   :  { %v255_v34 = vadd.f32 %v2798_v29, %v247_v26 }
 0x183   :  { %v3359_v33 = vpop.eup %3358 }
 0x184   :  { %508 = vmatprep.mubr.f32.mxu1 %v3359_v33  ;;  %579 = vmatprep.mubr.f32.mxu0 %v3359_v33 }
 0x185   :  { %509 = vmatmul.mubr.f32.vlgmr.msra.gmra.mrb[0].mxu1 %v255_v34  ;;  %580 = vmatmul.mubr.f32.vlgmr.msra.gmra.mrb[2].mxu0 %v255_v34 }
 0x186   :  { %3307 = vmatpush3.bf16.msra.mxu1 %v3306_v32  ;;  %650 = vmatprep.mubr.f32.mxu1 %v3359_v33 }
 0x187   :  { %3309 = vmatprep.subr.bf16.mxu1 %v3308_v35  ;;  %2475 = vmatpush1.bf16.msra.mxu0 %v2805_v12  ;;  %v949_v12 = vld [vmem:[#allocation10 + $0x440] sm:$0xff] }
 0x18a   :  { %3311 = vmatpush3.bf16.msra.mxu1 %v3310_v40 }
 0x18b   :  { %3313 = vmatprep.subr.bf16.mxu1 %v3312_v41 }
 0x18e   :  { %3315 = vmatpush3.bf16.msra.mxu1 %v3314_v46 }
 0x18f   :  { %3317 = vmatprep.subr.bf16.mxu1 %v3316_v47 }
 0x192   :  { %3319 = vmatpush3.bf16.msra.mxu1 %v3318_v52 }
 0x193   :  { %3321 = vmatprep.subr.bf16.mxu1 %v3320_v53 }
 0x196   :  { %3323 = vmatpush3.bf16.msra.mxu1 %v3322_v58 }
 0x197   :  { %3325 = vmatprep.subr.bf16.mxu1 %v3324_v59 }
 0x19a   :  { %3327 = vmatpush3.bf16.msra.mxu1 %v3326_v0 }
 0x19b   :  { %3329 = vmatprep.subr.bf16.mxu1 %v3328_v1 }
 0x19e   :  { %3331 = vmatpush3.bf16.msra.mxu1 %v3330_v6  ;;  %v2803_v6 = vcombine.low %v813_v2, %v821_v3 }
 0x19f   :  { %3333 = vmatprep.subr.bf16.mxu1 %v3332_v7  ;;  %v2804_v7 = vcombine.high %v813_v2, %v821_v3  ;;  %v925_v2 = vld [vmem:[#allocation10 + $0x380] sm:$0xff] }
 0x1a0   :  { %v933_v3 = vld [vmem:[#allocation10 + $0x3c0] sm:$0xff] }
 0x1a2   :  { %3335 = vmatpush3.bf16.msra.mxu1 %v3334_v10  ;;  %v837_v10 = vld [vmem:[#allocation10 + $0xc0] sm:$0xff] }
 0x1a3   :  { %3336 = vmatprep.subr.bf16.mxu1 %v3550_v11 }
 0x1a5   :  { %651 = vmatmul.mubr.f32.vlgmr.msra.gmra.mrb[2].mxu1 %v255_v34 }
 0x1a6   :  { %3338 = vmatpush3.bf16.msra.mxu1 %v3337_v17  ;;  %3125 = vmatprep.mubr.msk.f32.mxu1 %vm3551_vm1, %v3552_v18  ;;  %v830_v17 = vld [vmem:[#allocation10 + $0x88] sm:$0xff] }
 0x1a7   :  { %v838_v18 = vld [vmem:[#allocation10 + $0xc8] sm:$0xff]  ;;  %2433 = vmatprep.subr.bf16.mxu1 %v2804_v7 }
 0x258   :  { %v510_v25 = vpop.f32.mrb[0].mxu1  ;;  %v581_v26 = vpop.f32.mrb[2].mxu0 }
 0x259   :  { %v511_v28 = vadd.f32 %v510_v25, %v422_v22  ;;  %v582_v29 = vadd.f32 %v581_v26, %v430_v23  ;;  %v512_v30 = vpop.f32.mrb[1].mxu1  ;;  %v583_v31 = vpop.f32.mrb[3].mxu0  ;;  %v2820_v22 = vcombine.high %v829_v9, %v837_v10  ;;  %v2822_v23 = vcombine.high %v830_v17, %v838_v18  ;;  %v846_v25 = vld [vmem:[#allocation10 + $0x108] sm:$0xff] }
 0x25a   :  { %v513_v32 = vadd.f32 %v512_v30, %v426_v24  ;;  %v584_v34 = vadd.f32 %v583_v31, %v434_v27  ;;  %v853_v24 = vld [vmem:[#allocation10 + $0x140] sm:$0xff]  ;;  %v854_v26 = vld [vmem:[#allocation10 + $0x148] sm:$0xff]  ;;  %v2819_v27 = vcombine.low %v829_v9, %v837_v10  ;;  %v2916_v9 = vcombine.high %v925_v2, %v933_v3 }
 0x25b   :  { %2777 = vst [vmem:[#allocation13 + $0x40] sm:$0xff] %v511_v28  ;;  %3126 = vmatmul.mubr.msk.f32.vlgmr.msra.gmra.mrb[4].mxu1 %vm665_vm2, %v511_v28  ;;  %v767_v33 = vsel %vm766_vm3, %v582_v29, -inf  ;;  %v2821_v28 = vcombine.low %v830_v17, %v838_v18  ;;  %2476 = vmatprep.subr.bf16.mxu0 %v2822_v23  ;;  %v2838_v30 = vcombine.high %v846_v25, %v854_v26  ;;  %v861_v31 = vld [vmem:[#allocation10 + $0x180] sm:$0xff]  ;;  %v950_v17 = vld [vmem:[#allocation10 + $0x448] sm:$0xff] }
 0x25c   :  { %768 = vmax.xlane.f32.xlu1 %v767_v33  ;;  %v757_v35 = vsel %vm756_vm4, %v513_v32, -inf  ;;  %v777_v36 = vsel %vm776_vm5, %v584_v34, -inf  ;;  %2434 = vmatpush1.bf16.msra.mxu1 %v2803_v6  ;;  %v862_v33 = vld [vmem:[#allocation10 + $0x188] sm:$0xff]  ;;  %v2915_v18 = vcombine.low %v925_v2, %v933_v3  ;;  %v2934_v23 = vcombine.high %v942_v13, %v950_v17  ;;  %v1037_v3 = vld [vmem:[#allocation10 + $0x700] sm:$0xff] }
 0x25d   :  { %758 = vmax.xlane.f32.xlu0 %v757_v35  ;;  %2435 = vmatprep.subr.bf16.mxu1 %v2820_v22  ;;  %v2835_v35 = vcombine.low %v845_v20, %v853_v24  ;;  %v934_v6 = vld [vmem:[#allocation10 + $0x3c8] sm:$0xff] }
 0x25e   :  { %2477 = vmatpush1.bf16.msra.mxu0 %v2821_v28  ;;  %v2918_v10 = vcombine.high %v926_v4, %v934_v6 }
 0x25f   :  { %2478 = vmatprep.subr.bf16.mxu0 %v2838_v30 }
 0x260   :  { %2436 = vmatpush1.bf16.msra.mxu1 %v2819_v27  ;;  %v966_v27 = vld [vmem:[#allocation10 + $0x4c8] sm:$0xff] }
 0x261   :  { %778 = vmax.xlane.f32.xlu0 %v777_v36  ;;  %v2837_v36 = vcombine.low %v846_v25, %v854_v26  ;;  %v965_v25 = vld [vmem:[#allocation10 + $0x4c0] sm:$0xff]  ;;  %v958_v26 = vld [vmem:[#allocation10 + $0x488] sm:$0xff] }
 0x263   :  { %2479 = vmatpush1.bf16.msra.mxu0 %v2837_v36 }
 0x278   :  { %v3115_v38 = vpop.f32.mrb[2].mxu1 }
 0x279   :  { %v3116_v40 = vpop.f32.mrb[3].mxu1 }
 0x27a   :  { %v3117_v41 = vadd.f32 %v3116_v40, %v3115_v38  ;;  %v877_v40 = vld [vmem:[#allocation10 + $0x200] sm:$0xff] }
 0x27c   :  { %v653_v42 = vadd.f32 %v3117_v41, %v438_v39  ;;  %v885_v41 = vld [vmem:[#allocation10 + $0x240] sm:$0xff] }
 0x27e   :  { %v787_v43 = vsel %vm786_vm6, %v653_v42, -inf }
 0x27f   :  { %788 = vmax.xlane.f32.xlu1 %v787_v43  ;;  %v886_v43 = vld [vmem:[#allocation10 + $0x248] sm:$0xff] }
 0x2e9   :  { %v769_v44 = vpop.xlane.xlu1 %768 }
 0x2ea   :  { %v770_v45 = vsub.f32 %v582_v29, %v769_v44  ;;  %v759_v46 = vpop.xlane.xlu0 %758  ;;  %v2836_v29 = vcombine.high %v845_v20, %v853_v24  ;;  %v2917_v20 = vcombine.low %v926_v4, %v934_v6  ;;  %v957_v24 = vld [vmem:[#allocation10 + $0x480] sm:$0xff]  ;;  %v1038_v6 = vld [vmem:[#allocation10 + $0x708] sm:$0xff] }
 0x2eb   :  { %v760_v47 = vsub.f32 %v513_v32, %v759_v46  ;;  %v869_v32 = vld [vmem:[#allocation10 + $0x1c0] sm:$0xff]  ;;  %v2868_v46 = vcombine.high %v877_v40, %v885_v41  ;;  %v2948_v30 = vcombine.high %v957_v24, %v965_v25  ;;  %v2947_v36 = vcombine.low %v957_v24, %v965_v25 }
 0x2ec   :  { %v771_v48 = vmul.f32 1.442695, %v770_v45  ;;  %2437 = vmatprep.subr.bf16.mxu1 %v2836_v29  ;;  %v2852_v38 = vcombine.high %v861_v31, %v869_v32  ;;  %v2851_v44 = vcombine.low %v861_v31, %v869_v32  ;;  %v2933_v29 = vcombine.low %v942_v13, %v950_v17  ;;  %v973_v32 = vld [vmem:[#allocation10 + $0x500] sm:$0xff]  ;;  %v1062_v13 = vld [vmem:[#allocation10 + $0x7c8] sm:$0xff] }
 0x2ed   :  { %v761_v49 = vmul.f32 1.442695, %v760_v47  ;;  %2438 = vmatpush1.bf16.msra.mxu1 %v2835_v35  ;;  %v2950_v31 = vcombine.high %v958_v26, %v966_v27  ;;  %v982_v35 = vld [vmem:[#allocation10 + $0x548] sm:$0xff]  ;;  %v1045_v4 = vld [vmem:[#allocation10 + $0x740] sm:$0xff] }
 0x2ee   :  { %v779_v50 = vpop.xlane.xlu0 %778  ;;  %2439 = vmatprep.subr.bf16.mxu1 %v2852_v38  ;;  %v2949_v38 = vcombine.low %v958_v26, %v966_v27  ;;  %v3027_v17 = vcombine.low %v1037_v3, %v1045_v4  ;;  %v1053_v25 = vld [vmem:[#allocation10 + $0x780] sm:$0xff] }
 0x2ef   :  { %3360 = vpow2.f32 %v761_v49  ;;  %v780_v51 = vsub.f32 %v584_v34, %v779_v50  ;;  %v870_v34 = vld [vmem:[#allocation10 + $0x1c8] sm:$0xff]  ;;  %v901_v49 = vld [vmem:[#allocation10 + $0x2c0] sm:$0xff] }
 0x2f0   :  { %3362 = vpow2.f32 %v771_v48  ;;  %v2854_v39 = vcombine.high %v862_v33, %v870_v34  ;;  %v2853_v45 = vcombine.low %v862_v33, %v870_v34  ;;  %v893_v48 = vld [vmem:[#allocation10 + $0x280] sm:$0xff]  ;;  %v894_v50 = vld [vmem:[#allocation10 + $0x288] sm:$0xff] }
 0x2f1   :  { %v781_v52 = vmul.f32 1.442695, %v780_v51  ;;  %v902_v51 = vld [vmem:[#allocation10 + $0x2c8] sm:$0xff]  ;;  %2440 = vmatpush1.bf16.msra.mxu1 %v2851_v44  ;;  %v981_v33 = vld [vmem:[#allocation10 + $0x540] sm:$0xff] }
 0x2f2   :  { %2480 = vmatprep.subr.bf16.mxu0 %v2854_v39  ;;  %2441 = vmatprep.subr.bf16.mxu1 %v2868_v46  ;;  %v974_v34 = vld [vmem:[#allocation10 + $0x508] sm:$0xff]  ;;  %v2964_v39 = vcombine.high %v973_v32, %v981_v33  ;;  %v1061_v26 = vld [vmem:[#allocation10 + $0x7c0] sm:$0xff] }
 0x2f3   :  { %3364 = vpow2.f32 %v781_v52  ;;  %v2867_v52 = vcombine.low %v877_v40, %v885_v41  ;;  %2481 = vmatpush1.bf16.msra.mxu0 %v2853_v45  ;;  %v2966_v40 = vcombine.high %v974_v34, %v982_v35  ;;  %v989_v41 = vld [vmem:[#allocation10 + $0x580] sm:$0xff]  ;;  %v998_v44 = vld [vmem:[#allocation10 + $0x5c8] sm:$0xff]  ;;  %v2963_v45 = vcombine.low %v973_v32, %v981_v33  ;;  %v816_v32 = vld [vmem:[#allocation10 + $0x18] sm:$0xff] }
 0x2f4   :  { %v2965_v46 = vcombine.low %v974_v34, %v982_v35  ;;  %v824_v34 = vld [vmem:[#allocation10 + $0x58] sm:$0xff] }
 0x2f5   :  { %2442 = vmatpush1.bf16.msra.mxu1 %v2867_v52  ;;  %v1014_v52 = vld [vmem:[#allocation10 + $0x648] sm:$0xff] }
 0x2f9   :  { %v3361_v53 = vpop.eup %3360 }
 0x2fa   :  { %v763_v54 = vsel %vm756_vm4, %v3361_v53, 0.0  ;;  %v3363_v55 = vpop.eup %3362 }
 0x2fb   :  { %764 = vadd.xlane.f32.xlu0 %v763_v54  ;;  %v773_v57 = vsel %vm766_vm3, %v3363_v55, 0.0  ;;  %v2884_v54 = vcombine.high %v893_v48, %v901_v49 }
 0x2fd   :  { %v3365_v56 = vpop.eup %3364  ;;  %2443 = vmatprep.subr.bf16.mxu1 %v2884_v54 }
 0x2fe   :  { %v783_v58 = vsel %vm776_vm5, %v3365_v56, 0.0  ;;  %v3700_v59 = vmul.f32 %v3365_v56, %v3361_v53  ;;  %v909_v56 = vld [vmem:[#allocation10 + $0x300] sm:$0xff] }
 0x2ff   :  { %774 = vadd.xlane.f32.xlu0 %v773_v57  ;;  %784 = vadd.xlane.f32.xlu1 %v783_v58  ;;  %v917_v57 = vld [vmem:[#allocation10 + $0x340] sm:$0xff]  ;;  %v910_v58 = vld [vmem:[#allocation10 + $0x308] sm:$0xff] }
 0x300   :  { %v2899_v7 = vcombine.low %v909_v56, %v917_v57 }
 0x30c   :  { %v789_v60 = vpop.xlane.xlu1 %788 }
 0x30d   :  { %v790_v61 = vsub.f32 %v653_v42, %v789_v60  ;;  %v878_v42 = vld [vmem:[#allocation10 + $0x208] sm:$0xff] }
 0x30e   :  { %v2870_v47 = vcombine.high %v878_v42, %v886_v43  ;;  %v2869_v53 = vcombine.low %v878_v42, %v886_v43  ;;  %v918_v60 = vld [vmem:[#allocation10 + $0x348] sm:$0xff]  ;;  %v997_v42 = vld [vmem:[#allocation10 + $0x5c0] sm:$0xff] }
 0x30f   :  { %v791_v62 = vmul.f32 1.442695, %v790_v61  ;;  %v2883_v61 = vcombine.low %v893_v48, %v901_v49  ;;  %v2901_v8 = vcombine.low %v910_v58, %v918_v60  ;;  %v990_v43 = vld [vmem:[#allocation10 + $0x588] sm:$0xff]  ;;  %v1005_v49 = vld [vmem:[#allocation10 + $0x600] sm:$0xff] }
 0x310   :  { %2482 = vmatprep.subr.bf16.mxu0 %v2870_v47  ;;  %v2980_v47 = vcombine.high %v989_v41, %v997_v42  ;;  %v2982_v48 = vcombine.high %v990_v43, %v998_v44  ;;  %v2981_v54 = vcombine.low %v990_v43, %v998_v44  ;;  %v2799_v44 = vld [vmem:[#allocation11 + $0x9] ss:$0 sm:$0xff] }
 0x311   :  { %3366 = vpow2.f32 %v791_v62  ;;  %2483 = vmatpush1.bf16.msra.mxu0 %v2869_v53  ;;  %v2885_v62 = vcombine.low %v894_v50, %v902_v51  ;;  %2444 = vmatpush1.bf16.msra.mxu1 %v2883_v61  ;;  %v2979_v53 = vcombine.low %v989_v41, %v997_v42  ;;  %v1030_v61 = vld [vmem:[#allocation10 + $0x6c8] sm:$0xff] }
 0x31b   :  { %v3367_v63 = vpop.eup %3366 }
 0x31c   :  { %v793_v0 = vsel %vm786_vm6, %v3367_v63, 0.0  ;;  %v3703_v1 = vmul.f32 %v3367_v63, %v3363_v55  ;;  %v2886_v55 = vcombine.high %v894_v50, %v902_v51  ;;  %v2900_v63 = vcombine.high %v909_v56, %v917_v57  ;;  %v1013_v50 = vld [vmem:[#allocation10 + $0x640] sm:$0xff]  ;;  %v1006_v51 = vld [vmem:[#allocation10 + $0x608] sm:$0xff] }
 0x31d   :  { %794 = vadd.xlane.f32.xlu1 %v793_v0  ;;  %v2902_v0 = vcombine.high %v910_v58, %v918_v60  ;;  %v2998_v56 = vcombine.high %v1006_v51, %v1014_v52  ;;  %v1021_v57 = vld [vmem:[#allocation10 + $0x680] sm:$0xff]  ;;  %v1022_v60 = vld [vmem:[#allocation10 + $0x688] sm:$0xff] }
 0x31e   :  { %2484 = vmatprep.subr.bf16.mxu0 %v2886_v55  ;;  %2445 = vmatprep.subr.bf16.mxu1 %v2900_v63  ;;  %v2996_v55 = vcombine.high %v1005_v49, %v1013_v50  ;;  %v1029_v58 = vld [vmem:[#allocation10 + $0x6c0] sm:$0xff]  ;;  %v2997_v63 = vcombine.low %v1006_v51, %v1014_v52  ;;  %v3014_v2 = vcombine.high %v1022_v60, %v1030_v61 }
 0x31f   :  { %2485 = vmatpush1.bf16.msra.mxu0 %v2885_v62  ;;  %2446 = vmatpush1.bf16.msra.mxu1 %v2899_v7  ;;  %v2995_v62 = vcombine.low %v1005_v49, %v1013_v50  ;;  %v1046_v7 = vld [vmem:[#allocation10 + $0x748] sm:$0xff] }
 0x320   :  { %2486 = vmatprep.subr.bf16.mxu0 %v2902_v0  ;;  %2447 = vmatprep.subr.bf16.mxu1 %v2916_v9  ;;  %v3012_v0 = vcombine.high %v1021_v57, %v1029_v58  ;;  %v3013_v9 = vcombine.low %v1022_v60, %v1030_v61  ;;  %v2802_v50 = vld [vmem:[#allocation11 + $0xb] ss:$0 sm:$0xff]  ;;  %v847_v61 = vld [vmem:[#allocation10 + $0x110] sm:$0xff] }
 0x323   :  { %2487 = vmatpush1.bf16.msra.mxu0 %v2901_v8  ;;  %2448 = vmatpush1.bf16.msra.mxu1 %v2915_v18  ;;  %v3011_v8 = vcombine.low %v1021_v57, %v1029_v58  ;;  %v3029_v18 = vcombine.low %v1038_v6, %v1046_v7  ;;  %v832_v57 = vld [vmem:[#allocation10 + $0x98] sm:$0xff] }
 0x324   :  { %2488 = vmatprep.subr.bf16.mxu0 %v2918_v10  ;;  %v3028_v10 = vcombine.high %v1037_v3, %v1045_v4 }
 0x327   :  { %2489 = vmatpush1.bf16.msra.mxu0 %v2917_v20 }
 0x328   :  { %2490 = vmatprep.subr.bf16.mxu0 %v2934_v23 }
 0x32b   :  { %2491 = vmatpush1.bf16.msra.mxu0 %v2933_v29  ;;  %v3043_v29 = vcombine.low %v1053_v25, %v1061_v26 }
 0x32c   :  { %2492 = vmatprep.subr.bf16.mxu0 %v2950_v31  ;;  %v823_v31 = vld [vmem:[#allocation10 + $0x50] sm:$0xff] }
 0x32e   :  { %v3705_v5 = vpop.f32.mrb[4].mxu1 }
 0x32f   :  { %v3127_v11 = vpop.f32.mrb[5].mxu1  ;;  %2493 = vmatpush1.bf16.msra.mxu0 %v2949_v38  ;;  %v2810_v38 = vcombine.high %v816_v32, %v824_v34 }
 0x330   :  { %v941_v11 = vld [vmem:[#allocation10 + $0x400] sm:$0xff]  ;;  %2494 = vmatprep.subr.bf16.mxu0 %v2966_v40 }
 0x331   :  { %v2932_v22 = vcombine.high %v941_v11, %v949_v12  ;;  %v2931_v28 = vcombine.low %v941_v11, %v949_v12  ;;  %v3030_v11 = vcombine.high %v1038_v6, %v1046_v7  ;;  %v1054_v12 = vld [vmem:[#allocation10 + $0x788] sm:$0xff] }
 0x332   :  { %v3046_v20 = vcombine.high %v1054_v12, %v1062_v13 }
 0x333   :  { %2449 = vmatprep.subr.bf16.mxu1 %v2932_v22  ;;  %2495 = vmatpush1.bf16.msra.mxu0 %v2965_v46  ;;  %v3045_v22 = vcombine.low %v1054_v12, %v1062_v13 }
 0x334   :  { %2450 = vmatpush1.bf16.msra.mxu1 %v2931_v28  ;;  %2496 = vmatprep.subr.bf16.mxu0 %v2982_v48  ;;  %v3044_v28 = vcombine.high %v1053_v25, %v1061_v26 }
 0x335   :  { %2451 = vmatprep.subr.bf16.mxu1 %v2948_v30  ;;  %v815_v30 = vld [vmem:[#allocation10 + $0x10] sm:$0xff] }
 0x336   :  { %v2808_v33 = vcombine.high %v815_v30, %v823_v31  ;;  %v2807_v35 = vcombine.low %v815_v30, %v823_v31  ;;  %v903_v30 = vld [vmem:[#allocation10 + $0x2d0] sm:$0xff]  ;;  %v896_v31 = vld [vmem:[#allocation10 + $0x298] sm:$0xff] }
 0x337   :  { %2497 = vmatpush1.bf16.msra.mxu0 %v2981_v54  ;;  %v831_v54 = vld [vmem:[#allocation10 + $0x90] sm:$0xff] }
 0x338   :  { %2452 = vmatpush1.bf16.msra.mxu1 %v2947_v36  ;;  %2498 = vmatprep.subr.bf16.mxu0 %v2998_v56  ;;  %v2809_v36 = vcombine.low %v816_v32, %v824_v34  ;;  %v839_v56 = vld [vmem:[#allocation10 + $0xd0] sm:$0xff]  ;;  %v904_v32 = vld [vmem:[#allocation10 + $0x2d8] sm:$0xff] }
 0x339   :  { %2453 = vmatprep.subr.bf16.mxu1 %v2964_v39  ;;  %v2823_v3 = vcombine.low %v831_v54, %v839_v56 }
 0x33b   :  { %2499 = vmatpush1.bf16.msra.mxu0 %v2997_v63  ;;  %v855_v63 = vld [vmem:[#allocation10 + $0x150] sm:$0xff] }
 0x33c   :  { %2454 = vmatpush1.bf16.msra.mxu1 %v2963_v45  ;;  %2500 = vmatprep.subr.bf16.mxu0 %v3014_v2  ;;  %v736_v45 = vadd.f32 %v2799_v44, %v3705_v5  ;;  %v840_v5 = vld [vmem:[#allocation10 + $0xd8] sm:$0xff]  ;;  %v2840_v6 = vcombine.high %v847_v61, %v855_v63  ;;  %v2839_v12 = vcombine.low %v847_v61, %v855_v63  ;;  %v959_v63 = vld [vmem:[#allocation10 + $0x490] sm:$0xff] }
 0x33d   :  { %2455 = vmatprep.subr.bf16.mxu1 %v2980_v47  ;;  %v2801_v47 = vld [vmem:[#allocation11 + $0xa] ss:$0 sm:$0xff]  ;;  %v856_v2 = vld [vmem:[#allocation10 + $0x158] sm:$0xff]  ;;  %v2825_v4 = vcombine.low %v832_v57, %v840_v5 }
 0x33e   :  { %v739_v46 = vmax.f32 %v736_v45, 0.0 }
 0x33f   :  { %2501 = vmatpush1.bf16.msra.mxu0 %v3013_v9  ;;  %v871_v9 = vld [vmem:[#allocation10 + $0x1d0] sm:$0xff] }
 0x340   :  { %2456 = vmatpush1.bf16.msra.mxu1 %v2979_v53  ;;  %2502 = vmatprep.subr.bf16.mxu0 %v3030_v11  ;;  %v747_v48 = vmul.f32 %v2801_v47, %v739_v46  ;;  %v872_v11 = vld [vmem:[#allocation10 + $0x1d8] sm:$0xff]  ;;  %v927_v46 = vld [vmem:[#allocation10 + $0x390] sm:$0xff] }
 0x341   :  { %2457 = vmatprep.subr.bf16.mxu1 %v2996_v55  ;;  %v935_v47 = vld [vmem:[#allocation10 + $0x3d0] sm:$0xff] }
 0x342   :  { %v755_v51 = vadd.f32 %v2802_v50, %v747_v48  ;;  %v928_v48 = vld [vmem:[#allocation10 + $0x398] sm:$0xff] }
 0x343   :  { %2503 = vmatpush1.bf16.msra.mxu0 %v3029_v18 }
 0x344   :  { %2458 = vmatpush1.bf16.msra.mxu1 %v2995_v62  ;;  %2504 = vmatprep.subr.bf16.mxu0 %v3046_v20  ;;  %v3717_v60 = vpack.c.bf16 %v755_v51, %v755_v51  ;;  %v2826_v62 = vcombine.high %v832_v57, %v840_v5  ;;  %v879_v20 = vld [vmem:[#allocation10 + $0x210] sm:$0xff]  ;;  %v952_v57 = vld [vmem:[#allocation10 + $0x458] sm:$0xff]  ;;  %v2919_v5 = vcombine.low %v927_v46, %v935_v47 }
 0x345   :  { %2459 = vmatprep.subr.bf16.mxu1 %v3012_v0  ;;  %v848_v0 = vld [vmem:[#allocation10 + $0x118] sm:$0xff] }
 0x346   :  { %v2842_v7 = vcombine.high %v848_v0, %v856_v2  ;;  %v2841_v13 = vcombine.low %v848_v0, %v856_v2  ;;  %v967_v0 = vld [vmem:[#allocation10 + $0x4d0] sm:$0xff]  ;;  %v960_v2 = vld [vmem:[#allocation10 + $0x498] sm:$0xff] }
 0x347   :  { %2505 = vmatpush1.bf16.msra.mxu0 %v3045_v22  ;;  %v887_v22 = vld [vmem:[#allocation10 + $0x250] sm:$0xff] }
 0x348   :  { %2460 = vmatpush1.bf16.msra.mxu1 %v3011_v8  ;;  %2556 = vmatprep.subr.bf16.mxu0 %v2810_v38  ;;  %v863_v8 = vld [vmem:[#allocation10 + $0x190] sm:$0xff] }
 0x349   :  { %2461 = vmatprep.subr.bf16.mxu1 %v3028_v10  ;;  %v864_v10 = vld [vmem:[#allocation10 + $0x198] sm:$0xff]  ;;  %v2855_v25 = vcombine.low %v863_v8, %v871_v9  ;;  %v911_v38 = vld [vmem:[#allocation10 + $0x310] sm:$0xff] }
 0x34a   :  { %v2858_v18 = vcombine.high %v864_v10, %v872_v11  ;;  %v2857_v26 = vcombine.low %v864_v10, %v872_v11  ;;  %v983_v10 = vld [vmem:[#allocation10 + $0x550] sm:$0xff]  ;;  %v976_v11 = vld [vmem:[#allocation10 + $0x518] sm:$0xff] }
 0x34c   :  { %2462 = vmatpush1.bf16.msra.mxu1 %v3027_v17  ;;  %v2856_v17 = vcombine.high %v863_v8, %v871_v9  ;;  %v975_v9 = vld [vmem:[#allocation10 + $0x510] sm:$0xff] }
 0x34d   :  { %2463 = vmatprep.subr.bf16.mxu1 %v3044_v28 }
 0x350   :  { %2464 = vmatpush1.bf16.msra.mxu1 %v3043_v29  ;;  %v895_v29 = vld [vmem:[#allocation10 + $0x290] sm:$0xff] }
 0x351   :  { %2515 = vmatprep.subr.bf16.mxu1 %v2808_v33  ;;  %v2871_v33 = vcombine.low %v879_v20, %v887_v22 }
 0x388   :  { %v765_v23 = vpop.xlane.xlu0 %764 }
 0x38c   :  { %v785_v24 = vpop.xlane.xlu1 %784  ;;  %v775_v42 = vpop.xlane.xlu0 %774 }
 0x38d   :  { %v801_v27 = vmul.f32 %v785_v24, %v765_v23  ;;  %v880_v23 = vld [vmem:[#allocation10 + $0x218] sm:$0xff] }
 0x38e   :  { %v888_v24 = vld [vmem:[#allocation10 + $0x258] sm:$0xff] }
 0x38f   :  { %3368 = vrcp.f32 %v801_v27  ;;  %v2872_v27 = vcombine.high %v879_v20, %v887_v22  ;;  %v2874_v28 = vcombine.high %v880_v23, %v888_v24  ;;  %v2873_v34 = vcombine.low %v880_v23, %v888_v24  ;;  %v991_v22 = vld [vmem:[#allocation10 + $0x590] sm:$0xff]  ;;  %v992_v24 = vld [vmem:[#allocation10 + $0x598] sm:$0xff] }
 0x390   :  { %v999_v23 = vld [vmem:[#allocation10 + $0x5d0] sm:$0xff] }
 0x399   :  { %v3369_v39 = vpop.eup %3368 }
 0x39a   :  { %v803_v40 = vmul.f32 %v3369_v39, %v3700_v59  ;;  %v919_v39 = vld [vmem:[#allocation10 + $0x350] sm:$0xff]  ;;  %v892_v59 = vld [vmem:[#allocation10 + $0x278] sm:$0xff] }
 0x39b   :  { %v2904_v44 = vcombine.high %v911_v38, %v919_v39  ;;  %v2903_v50 = vcombine.low %v911_v38, %v919_v39  ;;  %v1023_v39 = vld [vmem:[#allocation10 + $0x690] sm:$0xff] }
 0x39c   :  { %805 = vrot.lane.b32.xlu0 %v803_v40, %s3553_s5  ;;  %v912_v40 = vld [vmem:[#allocation10 + $0x318] sm:$0xff] }
 0x3aa   :  { %v795_v41 = vpop.xlane.xlu1 %794 }
 0x3ab   :  { %v797_v43 = vmul.f32 %v795_v41, %v775_v42  ;;  %v920_v41 = vld [vmem:[#allocation10 + $0x358] sm:$0xff]  ;;  %v2887_v42 = vcombine.low %v895_v29, %v903_v30 }
 0x3ac   :  { %v2906_v45 = vcombine.high %v912_v40, %v920_v41  ;;  %v2905_v51 = vcombine.low %v912_v40, %v920_v41  ;;  %v1031_v40 = vld [vmem:[#allocation10 + $0x6d0] sm:$0xff]  ;;  %v1024_v41 = vld [vmem:[#allocation10 + $0x698] sm:$0xff] }
 0x3ad   :  { %3370 = vrcp.f32 %v797_v43  ;;  %v2889_v43 = vcombine.low %v896_v31, %v904_v32 }
 0x3b7   :  { %v3371_v49 = vpop.eup %3370 }
 0x3b8   :  { %v799_v52 = vmul.f32 %v3371_v49, %v3703_v1  ;;  %v2824_v1 = vcombine.high %v831_v54, %v839_v56  ;;  %v936_v49 = vld [vmem:[#allocation10 + $0x3d8] sm:$0xff]  ;;  %v943_v54 = vld [vmem:[#allocation10 + $0x410] sm:$0xff] }
 0x3b9   :  { %v944_v56 = vld [vmem:[#allocation10 + $0x418] sm:$0xff]  ;;  %v2921_v61 = vcombine.low %v928_v48, %v936_v49 }
 0x40e   :  { %v806_v53 = vpop.permute.xlu0 %805 }
 0x40f   :  { %v808_v55 = vsel %vm766_vm3, %v799_v52, %v806_v53  ;;  %v2920_v52 = vcombine.high %v927_v46, %v935_v47  ;;  %v2922_v53 = vcombine.high %v928_v48, %v936_v49  ;;  %v1039_v47 = vld [vmem:[#allocation10 + $0x710] sm:$0xff]  ;;  %v1040_v49 = vld [vmem:[#allocation10 + $0x718] sm:$0xff] }
 0x410   :  { %v3715_v58 = vpack.c.bf16 %v808_v55, %v808_v55  ;;  %v951_v55 = vld [vmem:[#allocation10 + $0x450] sm:$0xff] }
 0x411   :  { %v1047_v48 = vld [vmem:[#allocation10 + $0x750] sm:$0xff] }
 0x412   :  { %3061 = vmatprep.mubr.msk.bf16.mxu1 %vm3710_vm8, %v3715_v58  ;;  %3064 = vmatprep.mubr.msk.bf16.mxu0 %vm3710_vm8, %v3715_v58 }
 0x413   :  { %2466 = vmatmul.mubr.bf16.vlgmr.msra.gmra.mrb[8].mxu1 %v3717_v60  ;;  %2507 = vmatmul.mubr.bf16.vlgmr.msra.gmra.mrb[4].mxu0 %v3717_v60 }
 0x414   :  { %2516 = vmatpush1.bf16.msra.mxu1 %v2807_v35  ;;  %2557 = vmatpush1.bf16.msra.mxu0 %v2809_v36  ;;  %v2888_v35 = vcombine.high %v895_v29, %v903_v30  ;;  %v2890_v36 = vcombine.high %v896_v31, %v904_v32  ;;  %v1007_v30 = vld [vmem:[#allocation10 + $0x610] sm:$0xff]  ;;  %v1008_v32 = vld [vmem:[#allocation10 + $0x618] sm:$0xff] }
 0x415   :  { %3067 = vmatprep.mubr.msk.bf16.mxu1 %vm3710_vm8, %v3715_v58  ;;  %3070 = vmatprep.mubr.msk.bf16.mxu0 %vm3710_vm8, %v3715_v58  ;;  %v1015_v31 = vld [vmem:[#allocation10 + $0x650] sm:$0xff] }
 0x416   :  { %2517 = vmatprep.subr.bf16.mxu1 %v2824_v1  ;;  %2558 = vmatprep.subr.bf16.mxu0 %v2826_v62  ;;  %v2936_v1 = vcombine.high %v943_v54, %v951_v55  ;;  %v2938_v62 = vcombine.high %v944_v56, %v952_v57 }
 0x418   :  { %2518 = vmatpush1.bf16.msra.mxu1 %v2823_v3  ;;  %2559 = vmatpush1.bf16.msra.mxu0 %v2825_v4  ;;  %v968_v3 = vld [vmem:[#allocation10 + $0x4d8] sm:$0xff]  ;;  %v2935_v4 = vcombine.low %v943_v54, %v951_v55  ;;  %v1055_v55 = vld [vmem:[#allocation10 + $0x790] sm:$0xff] }
 0x419   :  { %2519 = vmatprep.subr.bf16.mxu1 %v2840_v6  ;;  %2560 = vmatprep.subr.bf16.mxu0 %v2842_v7  ;;  %v2937_v6 = vcombine.low %v944_v56, %v952_v57  ;;  %v2952_v7 = vcombine.high %v959_v63, %v967_v0  ;;  %v2954_v8 = vcombine.high %v960_v2, %v968_v3  ;;  %v1063_v56 = vld [vmem:[#allocation10 + $0x7d0] sm:$0xff]  ;;  %v1056_v57 = vld [vmem:[#allocation10 + $0x798] sm:$0xff] }
 0x41c   :  { %2520 = vmatpush1.bf16.msra.mxu1 %v2839_v12  ;;  %2561 = vmatpush1.bf16.msra.mxu0 %v2841_v13  ;;  %v984_v12 = vld [vmem:[#allocation10 + $0x558] sm:$0xff]  ;;  %v2951_v13 = vcombine.low %v959_v63, %v967_v0  ;;  %v817_v0 = vld [vmem:[#allocation10 + $0x20] sm:$0xff] }
 0x41d   :  { %2521 = vmatprep.subr.bf16.mxu1 %v2856_v17  ;;  %2562 = vmatprep.subr.bf16.mxu0 %v2858_v18  ;;  %v2953_v17 = vcombine.low %v960_v2, %v968_v3  ;;  %v2968_v18 = vcombine.high %v975_v9, %v983_v10  ;;  %v2970_v20 = vcombine.high %v976_v11, %v984_v12  ;;  %v825_v2 = vld [vmem:[#allocation10 + $0x60] sm:$0xff]  ;;  %v818_v3 = vld [vmem:[#allocation10 + $0x28] sm:$0xff] }
 0x420   :  { %2522 = vmatpush1.bf16.msra.mxu1 %v2855_v25  ;;  %2563 = vmatpush1.bf16.msra.mxu0 %v2857_v26  ;;  %v1000_v25 = vld [vmem:[#allocation10 + $0x5d8] sm:$0xff]  ;;  %v2967_v26 = vcombine.low %v975_v9, %v983_v10  ;;  %v833_v10 = vld [vmem:[#allocation10 + $0xa0] sm:$0xff] }
 0x421   :  { %2523 = vmatprep.subr.bf16.mxu1 %v2872_v27  ;;  %2564 = vmatprep.subr.bf16.mxu0 %v2874_v28  ;;  %v2969_v27 = vcombine.low %v976_v11, %v984_v12  ;;  %v2984_v28 = vcombine.high %v991_v22, %v999_v23  ;;  %v2986_v29 = vcombine.high %v992_v24, %v1000_v25  ;;  %v841_v11 = vld [vmem:[#allocation10 + $0xe0] sm:$0xff]  ;;  %v834_v12 = vld [vmem:[#allocation10 + $0xa8] sm:$0xff] }
 0x424   :  { %2524 = vmatpush1.bf16.msra.mxu1 %v2871_v33  ;;  %2565 = vmatpush1.bf16.msra.mxu0 %v2873_v34  ;;  %v1016_v33 = vld [vmem:[#allocation10 + $0x658] sm:$0xff]  ;;  %v2983_v34 = vcombine.low %v991_v22, %v999_v23  ;;  %v849_v23 = vld [vmem:[#allocation10 + $0x120] sm:$0xff] }
 0x425   :  { %2525 = vmatprep.subr.bf16.mxu1 %v2888_v35  ;;  %2566 = vmatprep.subr.bf16.mxu0 %v2890_v36  ;;  %v2985_v35 = vcombine.low %v992_v24, %v1000_v25  ;;  %v3000_v36 = vcombine.high %v1007_v30, %v1015_v31  ;;  %v3002_v38 = vcombine.high %v1008_v32, %v1016_v33  ;;  %v857_v24 = vld [vmem:[#allocation10 + $0x160] sm:$0xff]  ;;  %v850_v25 = vld [vmem:[#allocation10 + $0x128] sm:$0xff] }
 0x428   :  { %2526 = vmatpush1.bf16.msra.mxu1 %v2887_v42  ;;  %2567 = vmatpush1.bf16.msra.mxu0 %v2889_v43  ;;  %v1032_v42 = vld [vmem:[#allocation10 + $0x6d8] sm:$0xff]  ;;  %v2999_v43 = vcombine.low %v1007_v30, %v1015_v31  ;;  %v865_v31 = vld [vmem:[#allocation10 + $0x1a0] sm:$0xff] }
 0x429   :  { %2527 = vmatprep.subr.bf16.mxu1 %v2904_v44  ;;  %2568 = vmatprep.subr.bf16.mxu0 %v2906_v45  ;;  %v3001_v44 = vcombine.low %v1008_v32, %v1016_v33  ;;  %v3016_v45 = vcombine.high %v1023_v39, %v1031_v40  ;;  %v3018_v46 = vcombine.high %v1024_v41, %v1032_v42  ;;  %v873_v32 = vld [vmem:[#allocation10 + $0x1e0] sm:$0xff]  ;;  %v866_v33 = vld [vmem:[#allocation10 + $0x1a8] sm:$0xff] }
 0x42c   :  { %2528 = vmatpush1.bf16.msra.mxu1 %v2903_v50  ;;  %2569 = vmatpush1.bf16.msra.mxu0 %v2905_v51  ;;  %v1048_v50 = vld [vmem:[#allocation10 + $0x758] sm:$0xff]  ;;  %v3015_v51 = vcombine.low %v1023_v39, %v1031_v40  ;;  %v881_v40 = vld [vmem:[#allocation10 + $0x220] sm:$0xff] }
 0x42d   :  { %2529 = vmatprep.subr.bf16.mxu1 %v2920_v52  ;;  %2570 = vmatprep.subr.bf16.mxu0 %v2922_v53  ;;  %v3017_v52 = vcombine.low %v1024_v41, %v1032_v42  ;;  %v3032_v53 = vcombine.high %v1039_v47, %v1047_v48  ;;  %v3034_v54 = vcombine.high %v1040_v49, %v1048_v50  ;;  %v889_v41 = vld [vmem:[#allocation10 + $0x260] sm:$0xff]  ;;  %v882_v42 = vld [vmem:[#allocation10 + $0x228] sm:$0xff] }
 0x430   :  { %2530 = vmatpush1.bf16.msra.mxu1 %v2919_v5  ;;  %2571 = vmatpush1.bf16.msra.mxu0 %v2921_v61  ;;  %v1064_v5 = vld [vmem:[#allocation10 + $0x7d8] sm:$0xff]  ;;  %v3031_v61 = vcombine.low %v1039_v47, %v1047_v48  ;;  %v897_v48 = vld [vmem:[#allocation10 + $0x2a0] sm:$0xff] }
 0x431   :  { %2531 = vmatprep.subr.bf16.mxu1 %v2936_v1  ;;  %2572 = vmatprep.subr.bf16.mxu0 %v2938_v62  ;;  %v3033_v1 = vcombine.low %v1040_v49, %v1048_v50  ;;  %v3048_v62 = vcombine.high %v1055_v55, %v1063_v56  ;;  %v3050_v63 = vcombine.high %v1056_v57, %v1064_v5  ;;  %v905_v49 = vld [vmem:[#allocation10 + $0x2e0] sm:$0xff]  ;;  %v898_v50 = vld [vmem:[#allocation10 + $0x2a8] sm:$0xff] }
 0x434   :  { %2532 = vmatpush1.bf16.msra.mxu1 %v2935_v4  ;;  %2573 = vmatpush1.bf16.msra.mxu0 %v2937_v6  ;;  %v826_v4 = vld [vmem:[#allocation10 + $0x68] sm:$0xff]  ;;  %v3047_v6 = vcombine.low %v1055_v55, %v1063_v56  ;;  %v913_v56 = vld [vmem:[#allocation10 + $0x320] sm:$0xff] }
 0x435   :  { %2533 = vmatprep.subr.bf16.mxu1 %v2952_v7  ;;  %2574 = vmatprep.subr.bf16.mxu0 %v2954_v8  ;;  %v3049_v7 = vcombine.low %v1056_v57, %v1064_v5  ;;  %v2812_v8 = vcombine.high %v817_v0, %v825_v2  ;;  %v2814_v9 = vcombine.high %v818_v3, %v826_v4  ;;  %v921_v57 = vld [vmem:[#allocation10 + $0x360] sm:$0xff]  ;;  %v914_v5 = vld [vmem:[#allocation10 + $0x328] sm:$0xff] }
 0x438   :  { %2534 = vmatpush1.bf16.msra.mxu1 %v2951_v13  ;;  %2575 = vmatpush1.bf16.msra.mxu0 %v2953_v17  ;;  %v842_v13 = vld [vmem:[#allocation10 + $0xe8] sm:$0xff]  ;;  %v2811_v17 = vcombine.low %v817_v0, %v825_v2  ;;  %v929_v2 = vld [vmem:[#allocation10 + $0x3a0] sm:$0xff] }
 0x439   :  { %2535 = vmatprep.subr.bf16.mxu1 %v2968_v18  ;;  %2576 = vmatprep.subr.bf16.mxu0 %v2970_v20  ;;  %v2813_v18 = vcombine.low %v818_v3, %v826_v4  ;;  %v2828_v20 = vcombine.high %v833_v10, %v841_v11  ;;  %v2830_v22 = vcombine.high %v834_v12, %v842_v13  ;;  %v937_v3 = vld [vmem:[#allocation10 + $0x3e0] sm:$0xff]  ;;  %v930_v4 = vld [vmem:[#allocation10 + $0x3a8] sm:$0xff] }
 0x43c   :  { %2536 = vmatpush1.bf16.msra.mxu1 %v2967_v26  ;;  %2577 = vmatpush1.bf16.msra.mxu0 %v2969_v27  ;;  %v858_v26 = vld [vmem:[#allocation10 + $0x168] sm:$0xff]  ;;  %v2827_v27 = vcombine.low %v833_v10, %v841_v11  ;;  %v945_v11 = vld [vmem:[#allocation10 + $0x420] sm:$0xff] }
 0x43d   :  { %2537 = vmatprep.subr.bf16.mxu1 %v2984_v28  ;;  %2578 = vmatprep.subr.bf16.mxu0 %v2986_v29  ;;  %v2829_v28 = vcombine.low %v834_v12, %v842_v13  ;;  %v2844_v29 = vcombine.high %v849_v23, %v857_v24  ;;  %v2846_v30 = vcombine.high %v850_v25, %v858_v26  ;;  %v953_v12 = vld [vmem:[#allocation10 + $0x460] sm:$0xff]  ;;  %v946_v13 = vld [vmem:[#allocation10 + $0x428] sm:$0xff] }
 0x440   :  { %2538 = vmatpush1.bf16.msra.mxu1 %v2983_v34  ;;  %2579 = vmatpush1.bf16.msra.mxu0 %v2985_v35  ;;  %v874_v34 = vld [vmem:[#allocation10 + $0x1e8] sm:$0xff]  ;;  %v2843_v35 = vcombine.low %v849_v23, %v857_v24  ;;  %v961_v24 = vld [vmem:[#allocation10 + $0x4a0] sm:$0xff] }
 0x441   :  { %2539 = vmatprep.subr.bf16.mxu1 %v3000_v36  ;;  %2580 = vmatprep.subr.bf16.mxu0 %v3002_v38  ;;  %v2845_v36 = vcombine.low %v850_v25, %v858_v26  ;;  %v2860_v38 = vcombine.high %v865_v31, %v873_v32  ;;  %v2862_v39 = vcombine.high %v866_v33, %v874_v34  ;;  %v969_v25 = vld [vmem:[#allocation10 + $0x4e0] sm:$0xff]  ;;  %v962_v26 = vld [vmem:[#allocation10 + $0x4a8] sm:$0xff] }
 0x444   :  { %2540 = vmatpush1.bf16.msra.mxu1 %v2999_v43  ;;  %2581 = vmatpush1.bf16.msra.mxu0 %v3001_v44  ;;  %v890_v43 = vld [vmem:[#allocation10 + $0x268] sm:$0xff]  ;;  %v2859_v44 = vcombine.low %v865_v31, %v873_v32  ;;  %v977_v32 = vld [vmem:[#allocation10 + $0x520] sm:$0xff] }
 0x445   :  { %2541 = vmatprep.subr.bf16.mxu1 %v3016_v45  ;;  %2582 = vmatprep.subr.bf16.mxu0 %v3018_v46  ;;  %v2861_v45 = vcombine.low %v866_v33, %v874_v34  ;;  %v2876_v46 = vcombine.high %v881_v40, %v889_v41  ;;  %v2878_v47 = vcombine.high %v882_v42, %v890_v43  ;;  %v985_v33 = vld [vmem:[#allocation10 + $0x560] sm:$0xff]  ;;  %v978_v34 = vld [vmem:[#allocation10 + $0x528] sm:$0xff] }
 0x448   :  { %2542 = vmatpush1.bf16.msra.mxu1 %v3015_v51  ;;  %2583 = vmatpush1.bf16.msra.mxu0 %v3017_v52  ;;  %v906_v51 = vld [vmem:[#allocation10 + $0x2e8] sm:$0xff]  ;;  %v2875_v52 = vcombine.low %v881_v40, %v889_v41  ;;  %v993_v41 = vld [vmem:[#allocation10 + $0x5a0] sm:$0xff] }
 0x449   :  { %2543 = vmatprep.subr.bf16.mxu1 %v3032_v53  ;;  %2584 = vmatprep.subr.bf16.mxu0 %v3034_v54  ;;  %v2877_v53 = vcombine.low %v882_v42, %v890_v43  ;;  %v2892_v54 = vcombine.high %v897_v48, %v905_v49  ;;  %v2894_v55 = vcombine.high %v898_v50, %v906_v51  ;;  %v1001_v42 = vld [vmem:[#allocation10 + $0x5e0] sm:$0xff]  ;;  %v994_v43 = vld [vmem:[#allocation10 + $0x5a8] sm:$0xff] }
 0x44c   :  { %2544 = vmatpush1.bf16.msra.mxu1 %v3031_v61  ;;  %2585 = vmatpush1.bf16.msra.mxu0 %v3033_v1  ;;  %v922_v61 = vld [vmem:[#allocation10 + $0x368] sm:$0xff]  ;;  %v2891_v1 = vcombine.low %v897_v48, %v905_v49  ;;  %v1009_v49 = vld [vmem:[#allocation10 + $0x620] sm:$0xff] }
 0x44d   :  { %2545 = vmatprep.subr.bf16.mxu1 %v3048_v62  ;;  %2586 = vmatprep.subr.bf16.mxu0 %v3050_v63  ;;  %v2893_v62 = vcombine.low %v898_v50, %v906_v51  ;;  %v2908_v63 = vcombine.high %v913_v56, %v921_v57  ;;  %v2910_v0 = vcombine.high %v914_v5, %v922_v61  ;;  %v1017_v50 = vld [vmem:[#allocation10 + $0x660] sm:$0xff]  ;;  %v1010_v51 = vld [vmem:[#allocation10 + $0x628] sm:$0xff] }
 0x450   :  { %2546 = vmatpush1.bf16.msra.mxu1 %v3047_v6  ;;  %2587 = vmatpush1.bf16.msra.mxu0 %v3049_v7  ;;  %v938_v6 = vld [vmem:[#allocation10 + $0x3e8] sm:$0xff]  ;;  %v2907_v7 = vcombine.low %v913_v56, %v921_v57  ;;  %v1025_v57 = vld [vmem:[#allocation10 + $0x6a0] sm:$0xff] }
 0x451   :  { %2597 = vmatprep.subr.bf16.mxu1 %v2812_v8  ;;  %2638 = vmatprep.subr.bf16.mxu0 %v2814_v9  ;;  %v2909_v8 = vcombine.low %v914_v5, %v922_v61  ;;  %v2924_v9 = vcombine.high %v929_v2, %v937_v3  ;;  %v2926_v10 = vcombine.high %v930_v4, %v938_v6  ;;  %v1033_v5 = vld [vmem:[#allocation10 + $0x6e0] sm:$0xff]  ;;  %v1026_v61 = vld [vmem:[#allocation10 + $0x6a8] sm:$0xff] }
 0x453   :  { %2548 = vmatmul.mubr.bf16.vlgmr.msra.gmra.mrb[12].mxu1 %v3717_v60  ;;  %2589 = vmatmul.mubr.bf16.vlgmr.msra.gmra.mrb[8].mxu0 %v3717_v60 }
 0x454   :  { %2598 = vmatpush1.bf16.msra.mxu1 %v2811_v17  ;;  %3073 = vmatprep.mubr.msk.bf16.mxu1 %vm3710_vm8, %v3715_v58  ;;  %v954_v17 = vld [vmem:[#allocation10 + $0x468] sm:$0xff] }
 0x455   :  { %2639 = vmatpush1.bf16.msra.mxu0 %v2813_v18  ;;  %3076 = vmatprep.mubr.msk.bf16.mxu0 %vm3710_vm8, %v3715_v58  ;;  %v2923_v18 = vcombine.low %v929_v2, %v937_v3  ;;  %v2942_v23 = vcombine.high %v946_v13, %v954_v17  ;;  %v1041_v3 = vld [vmem:[#allocation10 + $0x720] sm:$0xff] }
 0x456   :  { %2599 = vmatprep.subr.bf16.mxu1 %v2828_v20  ;;  %2640 = vmatprep.subr.bf16.mxu0 %v2830_v22  ;;  %v2925_v20 = vcombine.low %v930_v4, %v938_v6  ;;  %v2940_v22 = vcombine.high %v945_v11, %v953_v12  ;;  %v1049_v4 = vld [vmem:[#allocation10 + $0x760] sm:$0xff]  ;;  %v1042_v6 = vld [vmem:[#allocation10 + $0x728] sm:$0xff] }
 0x458   :  { %2600 = vmatpush1.bf16.msra.mxu1 %v2827_v27  ;;  %v970_v27 = vld [vmem:[#allocation10 + $0x4e8] sm:$0xff] }
 0x459   :  { %2641 = vmatpush1.bf16.msra.mxu0 %v2829_v28  ;;  %2601 = vmatprep.subr.bf16.mxu1 %v2844_v29  ;;  %v2939_v28 = vcombine.low %v945_v11, %v953_v12  ;;  %v2941_v29 = vcombine.low %v946_v13, %v954_v17  ;;  %v2958_v31 = vcombine.high %v962_v26, %v970_v27  ;;  %v1057_v12 = vld [vmem:[#allocation10 + $0x7a0] sm:$0xff]  ;;  %v1058_v17 = vld [vmem:[#allocation10 + $0x7a8] sm:$0xff] }
 0x45a   :  { %2642 = vmatprep.subr.bf16.mxu0 %v2846_v30  ;;  %v2956_v30 = vcombine.high %v961_v24, %v969_v25  ;;  %v1065_v13 = vld [vmem:[#allocation10 + $0x7e0] sm:$0xff] }
 0x45c   :  { %2602 = vmatpush1.bf16.msra.mxu1 %v2843_v35  ;;  %v986_v35 = vld [vmem:[#allocation10 + $0x568] sm:$0xff] }
 0x45d   :  { %2643 = vmatpush1.bf16.msra.mxu0 %v2845_v36  ;;  %2603 = vmatprep.subr.bf16.mxu1 %v2860_v38  ;;  %v2955_v36 = vcombine.low %v961_v24, %v969_v25  ;;  %v2957_v38 = vcombine.low %v962_v26, %v970_v27  ;;  %v2974_v40 = vcombine.high %v978_v34, %v986_v35  ;;  %v819_v25 = vld [vmem:[#allocation10 + $0x30] sm:$0xff]  ;;  %v820_v27 = vld [vmem:[#allocation10 + $0x38] sm:$0xff] }
 0x45e   :  { %2644 = vmatprep.subr.bf16.mxu0 %v2862_v39  ;;  %v2972_v39 = vcombine.high %v977_v32, %v985_v33  ;;  %v827_v26 = vld [vmem:[#allocation10 + $0x70] sm:$0xff] }
 0x460   :  { %2604 = vmatpush1.bf16.msra.mxu1 %v2859_v44  ;;  %v1002_v44 = vld [vmem:[#allocation10 + $0x5e8] sm:$0xff] }
 0x461   :  { %2645 = vmatpush1.bf16.msra.mxu0 %v2861_v45  ;;  %2605 = vmatprep.subr.bf16.mxu1 %v2876_v46  ;;  %v2971_v45 = vcombine.low %v977_v32, %v985_v33  ;;  %v2973_v46 = vcombine.low %v978_v34, %v986_v35  ;;  %v2990_v48 = vcombine.high %v994_v43, %v1002_v44  ;;  %v835_v33 = vld [vmem:[#allocation10 + $0xb0] sm:$0xff] }
 0x462   :  { %2646 = vmatprep.subr.bf16.mxu0 %v2878_v47  ;;  %v2988_v47 = vcombine.high %v993_v41, %v1001_v42  ;;  %v843_v34 = vld [vmem:[#allocation10 + $0xf0] sm:$0xff]  ;;  %v2815_v35 = vcombine.low %v819_v25, %v827_v26 }
 0x464   :  { %2606 = vmatpush1.bf16.msra.mxu1 %v2875_v52  ;;  %v1018_v52 = vld [vmem:[#allocation10 + $0x668] sm:$0xff] }
 0x465   :  { %2647 = vmatpush1.bf16.msra.mxu0 %v2877_v53  ;;  %2607 = vmatprep.subr.bf16.mxu1 %v2892_v54  ;;  %v2987_v53 = vcombine.low %v993_v41, %v1001_v42  ;;  %v2989_v54 = vcombine.low %v994_v43, %v1002_v44  ;;  %v3006_v56 = vcombine.high %v1010_v51, %v1018_v52  ;;  %v851_v41 = vld [vmem:[#allocation10 + $0x130] sm:$0xff]  ;;  %v852_v44 = vld [vmem:[#allocation10 + $0x138] sm:$0xff] }
 0x466   :  { %2648 = vmatprep.subr.bf16.mxu0 %v2894_v55  ;;  %v3004_v55 = vcombine.high %v1009_v49, %v1017_v50  ;;  %v859_v42 = vld [vmem:[#allocation10 + $0x170] sm:$0xff] }
 0x468   :  { %2608 = vmatpush1.bf16.msra.mxu1 %v2891_v1  ;;  %v1034_v1 = vld [vmem:[#allocation10 + $0x6e8] sm:$0xff] }
 0x469   :  { %2649 = vmatpush1.bf16.msra.mxu0 %v2893_v62  ;;  %2609 = vmatprep.subr.bf16.mxu1 %v2908_v63  ;;  %v3003_v62 = vcombine.low %v1009_v49, %v1017_v50  ;;  %v3005_v63 = vcombine.low %v1010_v51, %v1018_v52  ;;  %v3022_v2 = vcombine.high %v1026_v61, %v1034_v1  ;;  %v867_v50 = vld [vmem:[#allocation10 + $0x1b0] sm:$0xff]  ;;  %v868_v52 = vld [vmem:[#allocation10 + $0x1b8] sm:$0xff] }
 0x46a   :  { %2650 = vmatprep.subr.bf16.mxu0 %v2910_v0  ;;  %v3020_v0 = vcombine.high %v1025_v57, %v1033_v5  ;;  %v875_v51 = vld [vmem:[#allocation10 + $0x1f0] sm:$0xff] }
 0x46c   :  { %2610 = vmatpush1.bf16.msra.mxu1 %v2907_v7  ;;  %v1050_v7 = vld [vmem:[#allocation10 + $0x768] sm:$0xff] }
 0x46d   :  { %2651 = vmatpush1.bf16.msra.mxu0 %v2909_v8  ;;  %2611 = vmatprep.subr.bf16.mxu1 %v2924_v9  ;;  %v3019_v8 = vcombine.low %v1025_v57, %v1033_v5  ;;  %v3021_v9 = vcombine.low %v1026_v61, %v1034_v1  ;;  %v3038_v11 = vcombine.high %v1042_v6, %v1050_v7  ;;  %v883_v5 = vld [vmem:[#allocation10 + $0x230] sm:$0xff]  ;;  %v884_v1 = vld [vmem:[#allocation10 + $0x238] sm:$0xff] }
 0x46e   :  { %2652 = vmatprep.subr.bf16.mxu0 %v2926_v10  ;;  %v3036_v10 = vcombine.high %v1041_v3, %v1049_v4  ;;  %v891_v61 = vld [vmem:[#allocation10 + $0x270] sm:$0xff] }
 0x470   :  { %2612 = vmatpush1.bf16.msra.mxu1 %v2923_v18  ;;  %v1066_v18 = vld [vmem:[#allocation10 + $0x7e8] sm:$0xff] }
 0x471   :  { %2653 = vmatpush1.bf16.msra.mxu0 %v2925_v20  ;;  %2613 = vmatprep.subr.bf16.mxu1 %v2940_v22  ;;  %v3035_v20 = vcombine.low %v1041_v3, %v1049_v4  ;;  %v3037_v22 = vcombine.low %v1042_v6, %v1050_v7  ;;  %v3054_v24 = vcombine.high %v1058_v17, %v1066_v18  ;;  %v907_v3 = vld [vmem:[#allocation10 + $0x2f0] sm:$0xff]  ;;  %v900_v4 = vld [vmem:[#allocation10 + $0x2b8] sm:$0xff] }
 0x472   :  { %2654 = vmatprep.subr.bf16.mxu0 %v2942_v23  ;;  %v3052_v23 = vcombine.high %v1057_v12, %v1065_v13  ;;  %v908_v6 = vld [vmem:[#allocation10 + $0x2f8] sm:$0xff]  ;;  %v2879_v7 = vcombine.low %v883_v5, %v891_v61 }
 0x474   :  { %2614 = vmatpush1.bf16.msra.mxu1 %v2939_v28  ;;  %v828_v28 = vld [vmem:[#allocation10 + $0x78] sm:$0xff] }
 0x475   :  { %2655 = vmatpush1.bf16.msra.mxu0 %v2941_v29  ;;  %2615 = vmatprep.subr.bf16.mxu1 %v2956_v30  ;;  %v3051_v29 = vcombine.low %v1057_v12, %v1065_v13  ;;  %v3053_v30 = vcombine.low %v1058_v17, %v1066_v18  ;;  %v2818_v32 = vcombine.high %v820_v27, %v828_v28  ;;  %v923_v12 = vld [vmem:[#allocation10 + $0x370] sm:$0xff]  ;;  %v916_v13 = vld [vmem:[#allocation10 + $0x338] sm:$0xff] }
 0x476   :  { %2656 = vmatprep.subr.bf16.mxu0 %v2958_v31  ;;  %v2816_v31 = vcombine.high %v819_v25, %v827_v26  ;;  %v924_v17 = vld [vmem:[#allocation10 + $0x378] sm:$0xff]  ;;  %v939_v25 = vld [vmem:[#allocation10 + $0x3f0] sm:$0xff] }
 0x477   :  { %v932_v26 = vld [vmem:[#allocation10 + $0x3b8] sm:$0xff] }
 0x478   :  { %2616 = vmatpush1.bf16.msra.mxu1 %v2955_v36  ;;  %v836_v36 = vld [vmem:[#allocation10 + $0xb8] sm:$0xff] }
 0x479   :  { %2657 = vmatpush1.bf16.msra.mxu0 %v2957_v38  ;;  %2617 = vmatprep.subr.bf16.mxu1 %v2972_v39  ;;  %v844_v38 = vld [vmem:[#allocation10 + $0xf8] sm:$0xff]  ;;  %v2817_v39 = vcombine.low %v820_v27, %v828_v28 }
 0x47a   :  { %2658 = vmatprep.subr.bf16.mxu0 %v2974_v40  ;;  %v2832_v40 = vcombine.high %v835_v33, %v843_v34  ;;  %v2834_v43 = vcombine.high %v836_v36, %v844_v38  ;;  %v940_v27 = vld [vmem:[#allocation10 + $0x3f8] sm:$0xff] }
 0x47c   :  { %2618 = vmatpush1.bf16.msra.mxu1 %v2971_v45  ;;  %v860_v45 = vld [vmem:[#allocation10 + $0x178] sm:$0xff] }
 0x47d   :  { %2659 = vmatpush1.bf16.msra.mxu0 %v2973_v46  ;;  %2619 = vmatprep.subr.bf16.mxu1 %v2988_v47  ;;  %v2831_v46 = vcombine.low %v835_v33, %v843_v34  ;;  %v2833_v47 = vcombine.low %v836_v36, %v844_v38  ;;  %v2850_v49 = vcombine.high %v852_v44, %v860_v45  ;;  %v955_v33 = vld [vmem:[#allocation10 + $0x470] sm:$0xff]  ;;  %v948_v34 = vld [vmem:[#allocation10 + $0x438] sm:$0xff] }
 0x47e   :  { %2660 = vmatprep.subr.bf16.mxu0 %v2990_v48  ;;  %v2848_v48 = vcombine.high %v851_v41, %v859_v42  ;;  %v2929_v38 = vcombine.low %v932_v26, %v940_v27 }
 0x480   :  { %2620 = vmatpush1.bf16.msra.mxu1 %v2987_v53  ;;  %v876_v53 = vld [vmem:[#allocation10 + $0x1f8] sm:$0xff] }
 0x481   :  { %2661 = vmatpush1.bf16.msra.mxu0 %v2989_v54  ;;  %2621 = vmatprep.subr.bf16.mxu1 %v3004_v55  ;;  %v2847_v54 = vcombine.low %v851_v41, %v859_v42  ;;  %v2849_v55 = vcombine.low %v852_v44, %v860_v45  ;;  %v2866_v57 = vcombine.high %v868_v52, %v876_v53  ;;  %v963_v41 = vld [vmem:[#allocation10 + $0x4b0] sm:$0xff]  ;;  %v972_v44 = vld [vmem:[#allocation10 + $0x4f8] sm:$0xff] }
 0x482   :  { %2662 = vmatprep.subr.bf16.mxu0 %v3006_v56  ;;  %v2864_v56 = vcombine.high %v867_v50, %v875_v51  ;;  %v971_v42 = vld [vmem:[#allocation10 + $0x4f0] sm:$0xff] }
 0x484   :  { %2622 = vmatpush1.bf16.msra.mxu1 %v3003_v62  ;;  %v2865_v62 = vcombine.low %v868_v52, %v876_v53  ;;  %v988_v52 = vld [vmem:[#allocation10 + $0x578] sm:$0xff]  ;;  %v2959_v53 = vcombine.low %v963_v41, %v971_v42 }
 0x485   :  { %2663 = vmatpush1.bf16.msra.mxu0 %v3005_v63  ;;  %2623 = vmatprep.subr.bf16.mxu1 %v3020_v0  ;;  %v2880_v63 = vcombine.high %v883_v5, %v891_v61  ;;  %v2882_v0 = vcombine.high %v884_v1, %v892_v59  ;;  %v1003_v5 = vld [vmem:[#allocation10 + $0x5f0] sm:$0xff]  ;;  %v996_v61 = vld [vmem:[#allocation10 + $0x5b8] sm:$0xff] }
 0x486   :  { %2664 = vmatprep.subr.bf16.mxu0 %v3022_v2  ;;  %v899_v2 = vld [vmem:[#allocation10 + $0x2b0] sm:$0xff] }
 0x487   :  { %v2895_v18 = vcombine.low %v899_v2, %v907_v3 }
 0x488   :  { %2624 = vmatpush1.bf16.msra.mxu1 %v3019_v8  ;;  %v2881_v8 = vcombine.low %v884_v1, %v892_v59  ;;  %v1004_v1 = vld [vmem:[#allocation10 + $0x5f8] sm:$0xff] }
 0x489   :  { %2665 = vmatpush1.bf16.msra.mxu0 %v3021_v9  ;;  %2625 = vmatprep.subr.bf16.mxu1 %v3036_v10  ;;  %v2896_v9 = vcombine.high %v899_v2, %v907_v3  ;;  %v2898_v10 = vcombine.high %v900_v4, %v908_v6  ;;  %v1019_v2 = vld [vmem:[#allocation10 + $0x670] sm:$0xff]  ;;  %v1012_v3 = vld [vmem:[#allocation10 + $0x638] sm:$0xff] }
 0x48a   :  { %2666 = vmatprep.subr.bf16.mxu0 %v3038_v11  ;;  %v915_v11 = vld [vmem:[#allocation10 + $0x330] sm:$0xff] }
 0x48b   :  { %v2911_v28 = vcombine.low %v915_v11, %v923_v12 }
 0x48c   :  { %2626 = vmatpush1.bf16.msra.mxu1 %v3035_v20  ;;  %v2897_v20 = vcombine.low %v900_v4, %v908_v6  ;;  %v1020_v4 = vld [vmem:[#allocation10 + $0x678] sm:$0xff] }
 0x48d   :  { %2667 = vmatpush1.bf16.msra.mxu0 %v3037_v22  ;;  %2627 = vmatprep.subr.bf16.mxu1 %v3052_v23  ;;  %v2912_v22 = vcombine.high %v915_v11, %v923_v12  ;;  %v2914_v23 = vcombine.high %v916_v13, %v924_v17  ;;  %v1035_v11 = vld [vmem:[#allocation10 + $0x6f0] sm:$0xff]  ;;  %v1028_v12 = vld [vmem:[#allocation10 + $0x6b8] sm:$0xff] }
 0x48e   :  { %2668 = vmatprep.subr.bf16.mxu0 %v3054_v24  ;;  %v931_v24 = vld [vmem:[#allocation10 + $0x3b0] sm:$0xff] }
 0x48f   :  { %v2927_v36 = vcombine.low %v931_v24, %v939_v25 }
 0x490   :  { %2628 = vmatpush1.bf16.msra.mxu1 %v3051_v29  ;;  %v2913_v29 = vcombine.low %v916_v13, %v924_v17  ;;  %v1036_v13 = vld [vmem:[#allocation10 + $0x6f8] sm:$0xff] }
 0x491   :  { %2669 = vmatpush1.bf16.msra.mxu0 %v3053_v30  ;;  %2679 = vmatprep.subr.bf16.mxu1 %v2816_v31  ;;  %v2928_v30 = vcombine.high %v931_v24, %v939_v25  ;;  %v2930_v31 = vcombine.high %v932_v26, %v940_v27  ;;  %v1051_v24 = vld [vmem:[#allocation10 + $0x770] sm:$0xff]  ;;  %v1044_v25 = vld [vmem:[#allocation10 + $0x738] sm:$0xff] }
 0x492   :  { %2720 = vmatprep.subr.bf16.mxu0 %v2818_v32  ;;  %v947_v32 = vld [vmem:[#allocation10 + $0x430] sm:$0xff]  ;;  %v1052_v26 = vld [vmem:[#allocation10 + $0x778] sm:$0xff] }
 0x493   :  { %2630 = vmatmul.mubr.bf16.vlgmr.msra.gmra.mrb[16].mxu1 %v3717_v60  ;;  %v2943_v45 = vcombine.low %v947_v32, %v955_v33 }
 0x494   :  { %2671 = vmatmul.mubr.bf16.vlgmr.msra.gmra.mrb[12].mxu0 %v3717_v60  ;;  %2680 = vmatpush1.bf16.msra.mxu1 %v2815_v35  ;;  %v956_v35 = vld [vmem:[#allocation10 + $0x478] sm:$0xff] }
 0x495   :  { %3079 = vmatprep.mubr.msk.bf16.mxu1 %vm3710_vm8, %v3715_v58  ;;  %2721 = vmatpush1.bf16.msra.mxu0 %v2817_v39  ;;  %v2944_v39 = vcombine.high %v947_v32, %v955_v33  ;;  %v1067_v32 = vld [vmem:[#allocation10 + $0x7f0] sm:$0xff]  ;;  %v1060_v33 = vld [vmem:[#allocation10 + $0x7b8] sm:$0xff] }
 0x496   :  { %3082 = vmatprep.mubr.msk.bf16.mxu0 %vm3710_vm8, %v3715_v58  ;;  %2681 = vmatprep.subr.bf16.mxu1 %v2832_v40  ;;  %v2863_v58 = vcombine.low %v867_v50, %v875_v51  ;;  %v2946_v40 = vcombine.high %v948_v34, %v956_v35  ;;  %v987_v50 = vld [vmem:[#allocation10 + $0x570] sm:$0xff]  ;;  %v980_v51 = vld [vmem:[#allocation10 + $0x538] sm:$0xff] }
 0x497   :  { %2722 = vmatprep.subr.bf16.mxu0 %v2834_v43  ;;  %v964_v43 = vld [vmem:[#allocation10 + $0x4b8] sm:$0xff] }
 0x498   :  { %2682 = vmatpush1.bf16.msra.mxu1 %v2831_v46  ;;  %v2945_v46 = vcombine.low %v948_v34, %v956_v35  ;;  %v1068_v34 = vld [vmem:[#allocation10 + $0x7f8] sm:$0xff] }
 0x499   :  { %2723 = vmatpush1.bf16.msra.mxu0 %v2833_v47  ;;  %2683 = vmatprep.subr.bf16.mxu1 %v2848_v48  ;;  %v2960_v47 = vcombine.high %v963_v41, %v971_v42  ;;  %v2962_v48 = vcombine.high %v964_v43, %v972_v44  ;;  %v3057_v41 = vcombine.low %v1060_v33, %v1068_v34 }
 0x49a   :  { %2724 = vmatprep.subr.bf16.mxu0 %v2850_v49  ;;  %v979_v49 = vld [vmem:[#allocation10 + $0x530] sm:$0xff] }
 0x49b   :  { %v2975_v59 = vcombine.low %v979_v49, %v987_v50 }
 0x49c   :  { %2684 = vmatpush1.bf16.msra.mxu1 %v2847_v54  ;;  %v2961_v54 = vcombine.low %v964_v43, %v972_v44 }
 0x49d   :  { %2725 = vmatpush1.bf16.msra.mxu0 %v2849_v55  ;;  %2685 = vmatprep.subr.bf16.mxu1 %v2864_v56  ;;  %v2976_v55 = vcombine.high %v979_v49, %v987_v50  ;;  %v2978_v56 = vcombine.high %v980_v51, %v988_v52 }
 0x49e   :  { %2726 = vmatprep.subr.bf16.mxu0 %v2866_v57  ;;  %v995_v57 = vld [vmem:[#allocation10 + $0x5b0] sm:$0xff] }
 0x49f   :  { %v2991_v6 = vcombine.low %v995_v57, %v1003_v5 }
 0x4a0   :  { %2686 = vmatpush1.bf16.msra.mxu1 %v2863_v58  ;;  %v2977_v58 = vcombine.low %v980_v51, %v988_v52 }
 0x4a1   :  { %2727 = vmatpush1.bf16.msra.mxu0 %v2865_v62  ;;  %2687 = vmatprep.subr.bf16.mxu1 %v2880_v63  ;;  %v2992_v62 = vcombine.high %v995_v57, %v1003_v5  ;;  %v2994_v63 = vcombine.high %v996_v61, %v1004_v1  ;;  %v1069_v5 = vld [vmem:[#allocation11 + $0xc] sm:$0xff] }
 0x4a2   :  { %2728 = vmatprep.subr.bf16.mxu0 %v2882_v0  ;;  %v1011_v0 = vld [vmem:[#allocation10 + $0x630] sm:$0xff] }
 0x4a3   :  { %v3007_v17 = vcombine.low %v1011_v0, %v1019_v2 }
 0x4a4   :  { %2688 = vmatpush1.bf16.msra.mxu1 %v2879_v7  ;;  %v2993_v7 = vcombine.low %v996_v61, %v1004_v1  ;;  %v1070_v61 = vld [vmem:[#allocation11 + $0x14] sm:$0xff] }
 0x4a5   :  { %2729 = vmatpush1.bf16.msra.mxu0 %v2881_v8  ;;  %2689 = vmatprep.subr.bf16.mxu1 %v2896_v9  ;;  %v3008_v8 = vcombine.high %v1011_v0, %v1019_v2  ;;  %v3010_v9 = vcombine.high %v1012_v3, %v1020_v4  ;;  %v1108_v1 = vrot.slane %v1070_v61, %v3672_v15 }
 0x4a6   :  { %2730 = vmatprep.subr.bf16.mxu0 %v2898_v10  ;;  %v1027_v10 = vld [vmem:[#allocation10 + $0x6b0] sm:$0xff]  ;;  %v1088_v0 = vrot.slane %v1069_v5, %v3683_v21  ;;  %v1120_v2 = vrot.slane %v1070_v61, %v3683_v21 }
 0x4a7   :  { %v3023_v27 = vcombine.low %v1027_v10, %v1035_v11 }
 0x4a8   :  { %2690 = vmatpush1.bf16.msra.mxu1 %v2895_v18  ;;  %v3009_v18 = vcombine.low %v1012_v3, %v1020_v4 }
 0x4a9   :  { %2731 = vmatpush1.bf16.msra.mxu0 %v2897_v20  ;;  %2691 = vmatprep.subr.bf16.mxu1 %v2912_v22  ;;  %v3024_v20 = vcombine.high %v1027_v10, %v1035_v11  ;;  %v3026_v22 = vcombine.high %v1028_v12, %v1036_v13 }
 0x4aa   :  { %2732 = vmatprep.subr.bf16.mxu0 %v2914_v23  ;;  %v1043_v23 = vld [vmem:[#allocation10 + $0x730] sm:$0xff] }
 0x4ab   :  { %v3039_v35 = vcombine.low %v1043_v23, %v1051_v24 }
 0x4ac   :  { %2692 = vmatpush1.bf16.msra.mxu1 %v2911_v28  ;;  %v3025_v28 = vcombine.low %v1028_v12, %v1036_v13 }
 0x4ad   :  { %2733 = vmatpush1.bf16.msra.mxu0 %v2913_v29  ;;  %2693 = vmatprep.subr.bf16.mxu1 %v2928_v30  ;;  %v3040_v29 = vcombine.high %v1043_v23, %v1051_v24  ;;  %v3042_v30 = vcombine.high %v1044_v25, %v1052_v26 }
 0x4ae   :  { %2734 = vmatprep.subr.bf16.mxu0 %v2930_v31  ;;  %v1059_v31 = vld [vmem:[#allocation10 + $0x7b0] sm:$0xff] }
 0x4b0   :  { %2694 = vmatpush1.bf16.msra.mxu1 %v2927_v36  ;;  %v3041_v36 = vcombine.low %v1044_v25, %v1052_v26  ;;  %v1099_v25 = vsub.s32 6, %v3669_v14  ;;  %v1095_v26 = vsub.s32 5, %v3669_v14 }
 0x4b1   :  { %2735 = vmatpush1.bf16.msra.mxu0 %v2929_v38  ;;  %2695 = vmatprep.subr.bf16.mxu1 %v2944_v39  ;;  %v3056_v38 = vcombine.high %v1059_v31, %v1067_v32  ;;  %v3058_v39 = vcombine.high %v1060_v33, %v1068_v34 }
 0x4b2   :  { %2736 = vmatprep.subr.bf16.mxu0 %v2946_v40  ;;  %v3055_v40 = vcombine.low %v1059_v31, %v1067_v32  ;;  %v1096_v31 = vrot.slane %v1069_v5, %v1095_v26  ;;  %v1132_v32 = vrot.slane %v1070_v61, %v1099_v25  ;;  %v1128_v33 = vrot.slane %v1070_v61, %v1095_v26 }
 0x4b4   :  { %2696 = vmatpush1.bf16.msra.mxu1 %v2943_v45 }
 0x4b5   :  { %2737 = vmatpush1.bf16.msra.mxu0 %v2945_v46  ;;  %2697 = vmatprep.subr.bf16.mxu1 %v2960_v47 }
 0x4b6   :  { %2738 = vmatprep.subr.bf16.mxu0 %v2962_v48 }
 0x4b8   :  { %2698 = vmatpush1.bf16.msra.mxu1 %v2959_v53 }
 0x4b9   :  { %2739 = vmatpush1.bf16.msra.mxu0 %v2961_v54  ;;  %2699 = vmatprep.subr.bf16.mxu1 %v2976_v55 }
 0x4ba   :  { %2740 = vmatprep.subr.bf16.mxu0 %v2978_v56 }
 0x4bc   :  { %2700 = vmatpush1.bf16.msra.mxu1 %v2975_v59  ;;  %v1084_v59 = vrot.slane %v1069_v5, %v3680_v19 }
 0x4bd   :  { %2741 = vmatpush1.bf16.msra.mxu0 %v2977_v58  ;;  %2701 = vmatprep.subr.bf16.mxu1 %v2992_v62  ;;  %v1080_v58 = vrot.slane %v1069_v5, %v3675_v16  ;;  %v1116_v62 = vrot.slane %v1070_v61, %v3680_v19 }
 0x4be   :  { %2742 = vmatprep.subr.bf16.mxu0 %v2994_v63  ;;  %v1112_v63 = vrot.slane %v1070_v61, %v3675_v16 }
 0x4c0   :  { %2702 = vmatpush1.bf16.msra.mxu1 %v2991_v6 }
 0x4c1   :  { %2743 = vmatpush1.bf16.msra.mxu0 %v2993_v7  ;;  %2703 = vmatprep.subr.bf16.mxu1 %v3008_v8 }
 0x4c2   :  { %2744 = vmatprep.subr.bf16.mxu0 %v3010_v9 }
 0x4c4   :  { %2704 = vmatpush1.bf16.msra.mxu1 %v3007_v17 }
 0x4c5   :  { %2745 = vmatpush1.bf16.msra.mxu0 %v3009_v18  ;;  %2705 = vmatprep.subr.bf16.mxu1 %v3024_v20 }
 0x4c6   :  { %2746 = vmatprep.subr.bf16.mxu0 %v3026_v22 }
 0x4c8   :  { %2706 = vmatpush1.bf16.msra.mxu1 %v3023_v27  ;;  %v1103_v27 = vsub.s32 7, %v3669_v14 }
 0x4c9   :  { %2747 = vmatpush1.bf16.msra.mxu0 %v3025_v28  ;;  %2707 = vmatprep.subr.bf16.mxu1 %v3040_v29  ;;  %v1092_v28 = vrot.slane %v1069_v5, %v3693_v37  ;;  %v1124_v29 = vrot.slane %v1070_v61, %v3693_v37 }
 0x4ca   :  { %2748 = vmatprep.subr.bf16.mxu0 %v3042_v30  ;;  %v1100_v30 = vrot.slane %v1069_v5, %v1099_v25  ;;  %v1104_v34 = vrot.slane %v1069_v5, %v1103_v27 }
 0x4cc   :  { %2708 = vmatpush1.bf16.msra.mxu1 %v3039_v35  ;;  %v1136_v35 = vrot.slane %v1070_v61, %v1103_v27 }
 0x4cd   :  { %2749 = vmatpush1.bf16.msra.mxu0 %v3041_v36  ;;  %2709 = vmatprep.subr.bf16.mxu1 %v3056_v38 }
 0x4ce   :  { %2750 = vmatprep.subr.bf16.mxu0 %v3058_v39 }
 0x4d0   :  { %2710 = vmatpush1.bf16.msra.mxu1 %v3055_v40 }
 0x4d1   :  { %2751 = vmatpush1.bf16.msra.mxu0 %v3057_v41 }
 0x4d3   :  { %2712 = vmatmul.mubr.bf16.vlgmr.msra.gmra.mrb[20].mxu1 %v3717_v60 }
 0x4d4   :  { %2753 = vmatmul.mubr.bf16.vlgmr.msra.gmra.mrb[16].mxu0 %v3717_v60  ;;  %v1076_v60 = vrot.slane %v1069_v5, %v3672_v15 }
 0x4e6   :  { %v2467_v42 = vpop.f32.mrb[8].mxu1  ;;  %v2508_v43 = vpop.f32.mrb[4].mxu0 }
 0x4e7   :  { %v2469_v44 = vpop.f32.mrb[9].mxu1  ;;  %v2510_v45 = vpop.f32.mrb[5].mxu0  ;;  %v2468_v4 = vadd.f32 %v2467_v42, %v1076_v60  ;;  %v2509_v9 = vadd.f32 %v2508_v43, %v1084_v59 }
 0x4e8   :  { %v2471_v46 = vpop.f32.mrb[10].mxu1  ;;  %v2512_v47 = vpop.f32.mrb[6].mxu0  ;;  %v2470_v10 = vadd.f32 %v2469_v44, %v1080_v58  ;;  %v2511_v17 = vadd.f32 %v2510_v45, %v1088_v0 }
 0x4e9   :  { %v2472_v48 = vpop.f32.mrb[11].mxu1  ;;  %v2513_v49 = vpop.f32.mrb[7].mxu0 }
 0x526   :  { %v2549_v50 = vpop.f32.mrb[12].mxu1  ;;  %v2590_v51 = vpop.f32.mrb[8].mxu0 }
 0x527   :  { %v2551_v52 = vpop.f32.mrb[13].mxu1  ;;  %v3751_v53 = vpop.f32.mrb[9].mxu0  ;;  %v2550_v38 = vadd.f32 %v2549_v50, %v1092_v28  ;;  %v2591_v42 = vadd.f32 %v2590_v51, %v1100_v30 }
 0x528   :  { %v2553_v54 = vpop.f32.mrb[14].mxu1  ;;  %v2594_v55 = vpop.f32.mrb[10].mxu0  ;;  %v2552_v43 = vadd.f32 %v2551_v52, %v1096_v31  ;;  %v2593_v37 = vadd.f32 %v3751_v53, %v1104_v34 }
 0x529   :  { %v2554_v56 = vpop.f32.mrb[15].mxu1  ;;  %v2595_v57 = vpop.f32.mrb[11].mxu0 }
 0x566   :  { %v2631_v3 = vpop.f32.mrb[16].mxu1 }
 0x567   :  { %v2632_v6 = vadd.f32 %v2631_v3, %v1108_v1  ;;  %v2672_v7 = vpop.f32.mrb[12].mxu0  ;;  %v2633_v8 = vpop.f32.mrb[17].mxu1 }
 0x568   :  { %v2673_v15 = vadd.f32 %v2672_v7, %v1116_v62  ;;  %v2634_v11 = vadd.f32 %v2633_v8, %v1112_v63  ;;  %v2674_v12 = vpop.f32.mrb[13].mxu0  ;;  %v2635_v13 = vpop.f32.mrb[18].mxu1 }
 0x569   :  { %v2761_v18 = vmul.f32 %v2632_v6, %v2468_v4  ;;  %v2675_v19 = vadd.f32 %v2674_v12, %v1120_v2  ;;  %v2676_v20 = vpop.f32.mrb[14].mxu0  ;;  %v2636_v16 = vpop.f32.mrb[19].mxu1 }
 0x56a   :  { %v2763_v22 = vmul.f32 %v2673_v15, %v2509_v9  ;;  %v2762_v23 = vmul.f32 %v2634_v11, %v2470_v10  ;;  %v2677_v24 = vpop.f32.mrb[15].mxu0 }
 0x56b   :  { %2769 = vst [vmem:[#allocation13] sm:$0xff] %v2761_v18  ;;  %v2764_v21 = vmul.f32 %v2675_v19, %v2511_v17 }
 0x56c   :  { %2771 = vst [vmem:[#allocation13 + $0x10] sm:$0xff] %v2763_v22  ;;  %2770 = vst [vmem:[#allocation13 + $0x8] sm:$0xff] %v2762_v23 }
 0x56d   :  { %2772 = vst [vmem:[#allocation13 + $0x18] sm:$0xff] %v2764_v21 }
 0x5a6   :  { %v2713_v36 = vpop.f32.mrb[20].mxu1 }
 0x5a7   :  { %v2714_v39 = vadd.f32 %v2713_v36, %v1124_v29  ;;  %v2754_v40 = vpop.f32.mrb[16].mxu0  ;;  %v2715_v41 = vpop.f32.mrb[21].mxu1 }
 0x5a8   :  { %v2755_v44 = vadd.f32 %v2754_v40, %v1132_v32  ;;  %v2716_v45 = vadd.f32 %v2715_v41, %v1128_v33  ;;  %v2756_v14 = vpop.f32.mrb[17].mxu0  ;;  %v2717_v46 = vpop.f32.mrb[22].mxu1 }
 0x5a9   :  { %v2765_v47 = vmul.f32 %v2714_v39, %v2550_v38  ;;  %v2757_v48 = vadd.f32 %v2756_v14, %v1136_v35  ;;  %v2758_v49 = vpop.f32.mrb[18].mxu0  ;;  %v2718_v54 = vpop.f32.mrb[23].mxu1 }
 0x5aa   :  { %v2767_v55 = vmul.f32 %v2755_v44, %v2591_v42  ;;  %v2766_v56 = vmul.f32 %v2716_v45, %v2552_v43  ;;  %v2759_v50 = vpop.f32.mrb[19].mxu0 }
 0x5ab   :  { %2773 = vst [vmem:[#allocation13 + $0x20] sm:$0xff] %v2765_v47  ;;  %v2768_v57 = vmul.f32 %v2757_v48, %v2593_v37 }
 0x5ac   :  { %2775 = vst [vmem:[#allocation13 + $0x30] sm:$0xff] %v2767_v55  ;;  %2774 = vst [vmem:[#allocation13 + $0x28] sm:$0xff] %v2766_v56 }
 0x5ad   :  { %2776 = vst [vmem:[#allocation13 + $0x38] sm:$0xff] %v2768_v57 }
 0x5ae   :  { %3515 = shalt.err (!%p3512_p10)
}
 0x5af   :  { %s3516_s25 = scalar_lea.hbm %s3785_s6, 1152 }
 0x5b0   :  { %p3517_p11 = scmp.ne.s32.totalorder %s3785_s6, %s3516_s25  ;;  %p3520_p12 = scmp.lt.u32.totalorder %s3516_s25, %s3785_s6 }
 0x5b2   :  { %p3522_p13 = pnand %p3520_p12, %p3517_p11 }
 0x5b4   :  { %3525 = shalt.err (!%p3522_p13)
}
 0x5b5   :  { %2787 = dma.vmem_to_hbm [thread:$0]  %s2785_s21, 1152, %s3785_s6, [#allocation4]  }
 0x5b6   :  { %3534 = dma.done.wait [#allocation4], 1152  }
 0x5b7   :  { %3535 = vsyncadd [#allocation4], 4294966144 }
 0x5b8   :  { %2791 = vsyncpa [#allocation3], 1 }
 0x5b9   :  { %2792 = vsyncpa [#allocation6], 1 }
 0x5ba   :  { %2793 = vsyncpa [#allocation9], 1 }
 0x5bb   :  { %2794 = vsyncpa [#allocation12], 1 }
 0x5bc   :  { %2795 = vsyncpa [#allocation4], 1 }

</bundles_post_ra>
